<compile_context>
chip_gen: v7x
topology: tpu7x:2x2x1
jax: 0.10.0
libtpu: 0.0.40
codegen_flags: <defaults>
</compile_context>

<pallas_src>
import numpy as np
import jax
import jax.numpy as jnp
from jax import lax
from jax.experimental import pallas as pl
from jax.experimental.pallas import tpu as pltpu


# ----------------------------------------------------------------------------
# Fused Pallas kernel: all SCAMP layers, state resident in VMEM.
# ----------------------------------------------------------------------------
def make_scamp_kernel(B, Lr, L, n, LM, Lc, Mr, Na, K, sigma2, sym_re, sym_im,
                      rtol=1e-5, atol=1e-8):
    inv_Lc = 1.0 / float(Lc)
    tau_scale = float(L) / float(Mr)
    inv_Na = 1.0 / float(Na)
    sigma2 = float(sigma2)
    sym_re = tuple(float(s) for s in sym_re)
    sym_im = tuple(float(s) for s in sym_im)
    HI = lax.Precision.HIGHEST

    def mm(a, b, precision=None, dims=(((1,), (0,)), ((), ()))):
        return lax.dot_general(a, b, dimension_numbers=dims,
                               precision=precision,
                               preferred_element_type=jnp.float32)

    def mm_t(a, b, precision=None):  # a @ b.T without materializing b.T
        return mm(a, b, precision, (((1,), (1,)), ((), ())))

    def kernel(W_ref, Are_ref, Aim_ref, Ry_ref, Rx_ref, yre_ref, yim_ref,
               zre_o, zim_o, phi_o, psi_o, xmre_o, xmim_o,
               xmapre_o, xmapim_o, iters_o,
               flag_ref):
        t = pl.program_id(0)

        # ----- step 0: Tracker.__init__ (state lives in the output blocks) -----
        @pl.when(t == 0)
        def _init():
            flag_ref[0] = jnp.int32(0)
            zre_o[...] = yre_ref[...]
            zim_o[...] = yim_ref[...]
            phi_o[...] = jnp.full((B, Lr), jnp.inf, dtype=jnp.float32)
            psi_o[...] = jnp.ones((B, L), dtype=jnp.float32)
            xmre_o[...] = jnp.zeros((B, LM), dtype=jnp.float32)
            xmim_o[...] = jnp.zeros((B, LM), dtype=jnp.float32)
            xmapre_o[...] = jnp.zeros((B, LM), dtype=jnp.float32)
            xmapim_o[...] = jnp.zeros((B, LM), dtype=jnp.float32)
            iters_o[...] = jnp.zeros((1, 1), dtype=jnp.int32)

        # ----- one SCAMPLayer.forward; skipped once psi has converged -----
        @pl.when(flag_ref[0] == 0)
        def _layer():
            W = W_ref[...]
            Are = Are_ref[...]
            Aim = Aim_ref[...]
            Ry = Ry_ref[...]
            Rx = Rx_ref[...]
            yre = yre_ref[...]
            yim = yim_ref[...]
            zre = zre_o[...]
            zim = zim_o[...]
            phi = phi_o[...]
            psi = psi_o[...]
            xre = xmre_o[...]
            xim = xmim_o[...]

            # gma = W @ psi / Lc   (row form: psi @ W.T)
            gma = mm_t(psi, W, HI) * inv_Lc            # (B, Lr)
            b = gma / phi                              # exact: phi = +inf -> 0.0
            phi_new = sigma2 + gma                     # > 0

            # repeat_interleave(Mr) of b and phi in one stacked 0/1 matmul
            bp = jnp.concatenate([b, phi_new], axis=0)  # (2B, Lr)
            bp_use = mm(bp, Ry, HI)                     # (2B, n)
            b_use = bp_use[:B]
            phi_use = bp_use[B:]

            # A @ xmmse with re/im stacked along rows: 2 MXU pushes of A (bf16).
            xri = jnp.concatenate([xre, xim], axis=0)  # (2B, LM)
            PA = mm_t(xri, Are)                        # (2B, n)
            QA = mm_t(xri, Aim)
            Ax_re = PA[:B] - QA[B:]
            Ax_im = QA[:B] + PA[B:]

            z_re = yre - Ax_re + b_use * zre
            z_im = yim - Ax_im + b_use * zim

            inv_phi = pl.reciprocal(phi_new, approx=True)
            tau = tau_scale * pl.reciprocal(mm(inv_phi, W, HI), approx=True)
            tau_use = mm(tau, Rx, HI)                  # repeat_interleave(Mc)
            inv_phi_use = pl.reciprocal(phi_use, approx=True)

            wre = z_re * inv_phi_use
            wim = z_im * inv_phi_use
            wri = jnp.concatenate([wre, wim], axis=0)  # (2B, n)
            RA = mm(wri, Are)                          # (2B, LM)
            RB = mm(wri, Aim)
            r_re = RA[:B] + RB[B:]                     # Re(A^H w)
            r_im = RA[B:] - RB[:B]                     # Im(A^H w)

            xmap_re = xre + tau_use * r_re
            xmap_im = xim + tau_use * r_im

            # ----------------- denoiser (per-symbol softmax) -----------------
            inv_tau2 = 2.0 * pl.reciprocal(tau_use, approx=True)   # 1/(tau/2)
            u = xmap_re * inv_tau2
            v = xmap_im * inv_tau2
            xs = [u * sym_re[k] + v * sym_im[k] for k in range(K)]
            mabs = jnp.abs(xs[0])
            for k in range(1, K):
                mabs = jnp.maximum(mabs, jnp.abs(xs[k]))
            m = jnp.max(mabs)          # global max (incl. batch), matches torch

            den = jnp.zeros((B, LM), jnp.float32)
            num_re = jnp.zeros((B, LM), jnp.float32)
            num_im = jnp.zeros((B, LM), jnp.float32)
            for k in range(K):
                eta = jnp.exp(xs[k] - m)   # argument <= 0: no overflow
                den = den + eta
                num_re = num_re + sym_re[k] * eta
                num_im = num_im + sym_im[k] * eta

            den_grp = mm_t(den, Rx, HI)       # sum over the M entries per group
            inv_grp = pl.reciprocal(den_grp, approx=True)   # small (B, L)
            inv_den = mm(inv_grp, Rx, HI)     # exact 0/1 broadcast back to (B, LM)
            xm_re = num_re * inv_den
            xm_im = num_im * inv_den

            psi_new = 1.0 - mm_t(xm_re * xm_re + xm_im * xm_im, Rx, HI) * inv_Na

            # write the state back (stays VMEM-resident for the next layer)
            zre_o[...] = z_re
            zim_o[...] = z_im
            phi_o[...] = phi_new
            psi_o[...] = psi_new
            xmre_o[...] = xm_re
            xmim_o[...] = xm_im
            xmapre_o[...] = xmap_re
            xmapim_o[...] = xmap_im
            iters_o[...] = jnp.broadcast_to((t + 1).astype(jnp.int32), (1, 1))

            # torch.allclose(psi_next, psi_prev): freeze the remaining layers.
            gap = jnp.max(jnp.abs(psi_new - psi) - (atol + rtol * jnp.abs(psi)))
            flag_ref[0] = (gap <= 0.0).astype(jnp.int32)

    return kernel


def build_scamp_fn(B, Lr, L, n, LM, Lc, Mr, Na, K, n_layers, sigma2,
                   sym_re, sym_im):
    kernel = make_scamp_kernel(B, Lr, L, n, LM, Lc, Mr, Na, K, sigma2,
                               sym_re, sym_im)
    in_shapes = [(Lr, L), (n, LM), (n, LM), (Lr, n), (L, LM), (B, n), (B, n)]
    out_shapes = [
        jax.ShapeDtypeStruct((B, n), jnp.float32),    # z re
        jax.ShapeDtypeStruct((B, n), jnp.float32),    # z im
        jax.ShapeDtypeStruct((B, Lr), jnp.float32),   # phi
        jax.ShapeDtypeStruct((B, L), jnp.float32),    # psi
        jax.ShapeDtypeStruct((B, LM), jnp.float32),   # xmmse re
        jax.ShapeDtypeStruct((B, LM), jnp.float32),   # xmmse im
        jax.ShapeDtypeStruct((B, LM), jnp.float32),   # xmap re
        jax.ShapeDtypeStruct((B, LM), jnp.float32),   # xmap im
        jax.ShapeDtypeStruct((1, 1), jnp.int32),      # iterations actually run
    ]
    in_specs = [pl.BlockSpec(s, lambda t: (0, 0)) for s in in_shapes]
    out_specs = [pl.BlockSpec(s.shape, lambda t: (0, 0)) for s in out_shapes]
    call = pl.pallas_call(
        kernel,
        out_shape=out_shapes,
        grid=(n_layers,),
        in_specs=in_specs,
        out_specs=out_specs,
        scratch_shapes=[pltpu.SMEM((1,), jnp.int32)],   # converged flag
        compiler_params=pltpu.CompilerParams(
            dimension_semantics=("arbitrary",)),
    )
    return jax.jit(call)


# ----------------------------------------------------------------------------
# float64 numpy reference (direct transcription of the PyTorch forward).
# ----------------------------------------------------------------------------
def reference_scamp_np(W, A, y, sigma2, symbols, B, L, Lc, Lr, Mr, Mc, M, LM,
                       Na, n_layers):
    W = np.asarray(W, np.float64)
    A = np.asarray(A, np.complex128)
    y = np.asarray(y, np.complex128)
    symbols = np.asarray(symbols, np.complex128)
    psi = np.ones((B, L, 1))
    phi = np.full((B, Lr, 1), np.inf)
    z = y.copy()
    xmmse = np.zeros((B, LM, 1), np.complex128)
    xmap = np.zeros((B, LM, 1), np.complex128)
    t_used = 0
    for t in range(n_layers):
        psi_prev = psi
        gma = np.matmul(W, psi) / Lc
        b = gma / phi
        z = y - np.matmul(A, xmmse) + np.repeat(b, Mr, axis=1) * z
        phi = sigma2 + gma
        tau = L / np.matmul(W.T, 1.0 / phi) / Mr
        tau_use = np.repeat(tau, Mc, axis=1)
        phi_use = np.repeat(phi, Mr, axis=1)
        xmap = xmmse + tau_use * np.matmul(np.conj(A.T), z / phi_use)
        s = xmap.reshape(B, L, M, 1)
        td = tau_use.reshape(B, L, M, 1) / 2.0
        xd = np.real((s / td) * np.conj(symbols)[None, None, None, :])
        eta = np.exp(xd - np.max(np.abs(xd)))
        eta2 = symbols[None, None, None, :] * eta
        xm = eta2.sum(axis=-1) / eta.sum(axis=-1).sum(axis=2, keepdims=True)
        xmmse = xm.reshape(B, LM, 1)
        psi = 1.0 - (np.abs(xmmse) ** 2).reshape(B, Lc, Mc).sum(
            axis=-1, keepdims=True) / Na
        t_used = t + 1
        if np.allclose(psi, psi_prev):
            break
    return xmap, xmmse, t_used


# ----------------------------------------------------------------------------
if __name__ == "__main__":
    # Small synthetic config (Config fields inferred from the module).
    B, Na, Nt, Nr, Lin, Lout, K = 2, 1, 4, 8, 8, 8, 4
    N_Layers = 4
    SNR = 10.0

    M = Nt // Na          # 4
    Mc = Nt               # 4
    Mr = Nr               # 8
    L = Na * Lin          # 8
    Lc = Lin              # 8
    Lr = Lout             # 8
    n = Mr * Lr           # 64
    LM = Mc * Lc          # 32
    E = Na / Nr
    sigma2 = E / SNR

    # QPSK constellation scaled so that sum_{Mc} |xmmse|^2 <= Na, keeping the
    # module's variance bookkeeping (psi = 1 - ||.||^2/Na) in [0, 1] and the
    # whole iteration finite.
    amp = np.sqrt(Na / Mc) / np.sqrt(2.0)
    symbols_np = (amp * np.array([1 + 1j, 1 - 1j, -1 + 1j, -1 - 1j])
                  ).astype(np.complex64)
    sym_re = tuple(float(np.real(s)) for s in symbols_np)
    sym_im = tuple(float(np.imag(s)) for s in symbols_np)

    # Deterministic synthetic problem.
    key = jax.random.PRNGKey(0)
    ka, kb, kx, kn1, kn2 = jax.random.split(key, 5)
    A = ((jax.random.normal(ka, (n, LM)) + 1j * jax.random.normal(kb, (n, LM)))
         / jnp.sqrt(2.0 * n)).astype(jnp.complex64)
    # W = per-block energy of A (positive, deterministic): (Lr, L)
    W = (jnp.abs(A) ** 2).reshape(Lr, Mr, L, M).sum(axis=(1, 3)).astype(jnp.float32)
    idx = jax.random.randint(kx, (B, LM), 0, K)
    x_true = jnp.asarray(symbols_np)[idx].reshape(B, LM, 1)
    noise = ((jax.random.normal(kn1, (B, n, 1)) + 1j * jax.random.normal(kn2, (B, n, 1)))
             * jnp.sqrt(sigma2 / 2.0)).astype(jnp.complex64)
    y = (jnp.matmul(A, x_true) + noise).astype(jnp.complex64)

    # Real/imag planes + constant 0/1 repeat / group-sum matrices.
    Are = jnp.real(A).astype(jnp.float32)
    Aim = jnp.imag(A).astype(jnp.float32)
    Ry = jnp.repeat(jnp.eye(Lr, dtype=jnp.float32), Mr, axis=1)   # (Lr, n)
    Rx = jnp.repeat(jnp.eye(L, dtype=jnp.float32), Mc, axis=1)    # (L, LM)
    yre = jnp.real(y)[..., 0].astype(jnp.float32)
    yim = jnp.imag(y)[..., 0].astype(jnp.float32)

    scamp_fn = build_scamp_fn(B, Lr, L, n, LM, Lc, Mr, Na, K, N_Layers, sigma2,
                              sym_re, sym_im)
    outs = jax.block_until_ready(scamp_fn(W, Are, Aim, Ry, Rx, yre, yim))
    (zre, zim, phi, psi, xre, xim, xmapre, xmapim, iters) = outs
    t_used = int(np.asarray(iters)[0, 0])

    # TODO(synk): the Loss class (self.L) was not provided; the forward here
    # returns (xmap, xmmse, #iterations) instead of the Loss object.

    # Correctness check against a float64 numpy transcription of the PyTorch code.
    xmap_ref, xmmse_ref, t_ref = reference_scamp_np(
        W, A, y, sigma2, symbols_np, B, L, Lc, Lr, Mr, Mc, M, LM, Na, N_Layers)

    xmmse_k = np.asarray(xre) + 1j * np.asarray(xim)
    xmap_k = np.asarray(xmapre) + 1j * np.asarray(xmapim)
    err_xmmse = float(np.max(np.abs(xmmse_k - xmmse_ref[..., 0])))
    err_xmap = float(np.max(np.abs(xmap_k - xmap_ref[..., 0])))
    assert np.isfinite(err_xmmse) and np.isfinite(err_xmap), "non-finite outputs"
    # Tolerance accounts for bf16 MXU passes on the A matmuls + approx reciprocals.
    assert err_xmmse < 2e-2, f"xmmse mismatch: {err_xmmse}"
    assert err_xmap < 2e-2, f"xmap mismatch: {err_xmap}"
    assert t_used >= 1

    print("KERNEL_OK")
</pallas_src>

<mosaic_0001>
module attributes {stable_mosaic.version = 11 : i64} {
  func.func @kernel(%arg0: i32, %arg1: memref<8x8xf32, #tpu.memory_space<vmem>>, %arg2: memref<64x32xf32, #tpu.memory_space<vmem>>, %arg3: memref<64x32xf32, #tpu.memory_space<vmem>>, %arg4: memref<8x64xf32, #tpu.memory_space<vmem>>, %arg5: memref<8x32xf32, #tpu.memory_space<vmem>>, %arg6: memref<2x64xf32, #tpu.memory_space<vmem>>, %arg7: memref<2x64xf32, #tpu.memory_space<vmem>>, %arg8: memref<2x64xf32, #tpu.memory_space<vmem>>, %arg9: memref<2x64xf32, #tpu.memory_space<vmem>>, %arg10: memref<2x8xf32, #tpu.memory_space<vmem>>, %arg11: memref<2x8xf32, #tpu.memory_space<vmem>>, %arg12: memref<2x32xf32, #tpu.memory_space<vmem>>, %arg13: memref<2x32xf32, #tpu.memory_space<vmem>>, %arg14: memref<2x32xf32, #tpu.memory_space<vmem>>, %arg15: memref<2x32xf32, #tpu.memory_space<vmem>>, %arg16: memref<1x1xi32, #tpu.memory_space<vmem>>, %arg17: memref<1xi32, #tpu.memory_space<smem>>) attributes {dimension_semantics = [#tpu.dimension_semantics<arbitrary>], iteration_bounds = array<i64: 4>, scalar_prefetch = 0 : i64, scratch_operands = 1 : i64, tpu.core_type = #tpu.core_type<tc>, window_params = [{pipeline_mode = #tpu.pipeline_mode<synchronous>, transform_indices = @transform_0, window_bounds = array<i64: 8, 8>}, {pipeline_mode = #tpu.pipeline_mode<synchronous>, transform_indices = @transform_1, window_bounds = array<i64: 64, 32>}, {pipeline_mode = #tpu.pipeline_mode<synchronous>, transform_indices = @transform_2, window_bounds = array<i64: 64, 32>}, {pipeline_mode = #tpu.pipeline_mode<synchronous>, transform_indices = @transform_3, window_bounds = array<i64: 8, 64>}, {pipeline_mode = #tpu.pipeline_mode<synchronous>, transform_indices = @transform_4, window_bounds = array<i64: 8, 32>}, {pipeline_mode = #tpu.pipeline_mode<synchronous>, transform_indices = @transform_5, window_bounds = array<i64: 2, 64>}, {pipeline_mode = #tpu.pipeline_mode<synchronous>, transform_indices = @transform_6, window_bounds = array<i64: 2, 64>}, {pipeline_mode = #tpu.pipeline_mode<synchronous>, transform_indices = @transform_7, window_bounds = array<i64: 2, 64>}, {pipeline_mode = #tpu.pipeline_mode<synchronous>, transform_indices = @transform_8, window_bounds = array<i64: 2, 64>}, {pipeline_mode = #tpu.pipeline_mode<synchronous>, transform_indices = @transform_9, window_bounds = array<i64: 2, 8>}, {pipeline_mode = #tpu.pipeline_mode<synchronous>, transform_indices = @transform_10, window_bounds = array<i64: 2, 8>}, {pipeline_mode = #tpu.pipeline_mode<synchronous>, transform_indices = @transform_11, window_bounds = array<i64: 2, 32>}, {pipeline_mode = #tpu.pipeline_mode<synchronous>, transform_indices = @transform_12, window_bounds = array<i64: 2, 32>}, {pipeline_mode = #tpu.pipeline_mode<synchronous>, transform_indices = @transform_13, window_bounds = array<i64: 2, 32>}, {pipeline_mode = #tpu.pipeline_mode<synchronous>, transform_indices = @transform_14, window_bounds = array<i64: 2, 32>}, {pipeline_mode = #tpu.pipeline_mode<synchronous>, transform_indices = @transform_15, window_bounds = array<i64: 1, 1>}]} {
    %c0_i32 = arith.constant 0 : i32
    %0 = arith.cmpi eq, %arg0, %c0_i32 : i32
    %1 = arith.extui %0 : i1 to i32
    %c0_i32_0 = arith.constant 0 : i32
    %2 = arith.cmpi ne, %1, %c0_i32_0 : i32
    scf.if %2 {
      %c0_i32_3 = arith.constant 0 : i32
      %c0_4 = arith.constant 0 : index
      %7 = memref.load %arg17[%c0_4] : memref<1xi32, #tpu.memory_space<smem>>
      memref.store %c0_i32_3, %arg17[%c0_4] : memref<1xi32, #tpu.memory_space<smem>>
      %c0_5 = arith.constant 0 : index
      %c0_6 = arith.constant 0 : index
      %8 = vector.load %arg6[%c0_5, %c0_6] : memref<2x64xf32, #tpu.memory_space<vmem>>, vector<2x64xf32>
      %c0_7 = arith.constant 0 : index
      %c0_8 = arith.constant 0 : index
      %9 = vector.load %arg8[%c0_7, %c0_8] : memref<2x64xf32, #tpu.memory_space<vmem>>, vector<2x64xf32>
      tpu.vector_store %arg8[%c0_7, %c0_8], %8 {strides = array<i32>} : memref<2x64xf32, #tpu.memory_space<vmem>>, vector<2x64xf32>,
      %c0_9 = arith.constant 0 : index
      %c0_10 = arith.constant 0 : index
      %10 = vector.load %arg7[%c0_9, %c0_10] : memref<2x64xf32, #tpu.memory_space<vmem>>, vector<2x64xf32>
      %c0_11 = arith.constant 0 : index
      %c0_12 = arith.constant 0 : index
      %11 = vector.load %arg9[%c0_11, %c0_12] : memref<2x64xf32, #tpu.memory_space<vmem>>, vector<2x64xf32>
      tpu.vector_store %arg9[%c0_11, %c0_12], %10 {strides = array<i32>} : memref<2x64xf32, #tpu.memory_space<vmem>>, vector<2x64xf32>,
      %cst = arith.constant 0x7F800000 : f32
      %12 = vector.broadcast %cst : f32 to vector<2x8xf32>
      %c0_13 = arith.constant 0 : index
      %c0_14 = arith.constant 0 : index
      %13 = vector.load %arg10[%c0_13, %c0_14] : memref<2x8xf32, #tpu.memory_space<vmem>>, vector<2x8xf32>
      tpu.vector_store %arg10[%c0_13, %c0_14], %12 {strides = array<i32>} : memref<2x8xf32, #tpu.memory_space<vmem>>, vector<2x8xf32>,
      %cst_15 = arith.constant 1.000000e+00 : f32
      %14 = vector.broadcast %cst_15 : f32 to vector<2x8xf32>
      %c0_16 = arith.constant 0 : index
      %c0_17 = arith.constant 0 : index
      %15 = vector.load %arg11[%c0_16, %c0_17] : memref<2x8xf32, #tpu.memory_space<vmem>>, vector<2x8xf32>
      tpu.vector_store %arg11[%c0_16, %c0_17], %14 {strides = array<i32>} : memref<2x8xf32, #tpu.memory_space<vmem>>, vector<2x8xf32>,
      %cst_18 = arith.constant 0.000000e+00 : f32
      %16 = vector.broadcast %cst_18 : f32 to vector<2x32xf32>
      %c0_19 = arith.constant 0 : index
      %c0_20 = arith.constant 0 : index
      %17 = vector.load %arg12[%c0_19, %c0_20] : memref<2x32xf32, #tpu.memory_space<vmem>>, vector<2x32xf32>
      tpu.vector_store %arg12[%c0_19, %c0_20], %16 {strides = array<i32>} : memref<2x32xf32, #tpu.memory_space<vmem>>, vector<2x32xf32>,
      %cst_21 = arith.constant 0.000000e+00 : f32
      %18 = vector.broadcast %cst_21 : f32 to vector<2x32xf32>
      %c0_22 = arith.constant 0 : index
      %c0_23 = arith.constant 0 : index
      %19 = vector.load %arg13[%c0_22, %c0_23] : memref<2x32xf32, #tpu.memory_space<vmem>>, vector<2x32xf32>
      tpu.vector_store %arg13[%c0_22, %c0_23], %18 {strides = array<i32>} : memref<2x32xf32, #tpu.memory_space<vmem>>, vector<2x32xf32>,
      %cst_24 = arith.constant 0.000000e+00 : f32
      %20 = vector.broadcast %cst_24 : f32 to vector<2x32xf32>
      %c0_25 = arith.constant 0 : index
      %c0_26 = arith.constant 0 : index
      %21 = vector.load %arg14[%c0_25, %c0_26] : memref<2x32xf32, #tpu.memory_space<vmem>>, vector<2x32xf32>
      tpu.vector_store %arg14[%c0_25, %c0_26], %20 {strides = array<i32>} : memref<2x32xf32, #tpu.memory_space<vmem>>, vector<2x32xf32>,
      %cst_27 = arith.constant 0.000000e+00 : f32
      %22 = vector.broadcast %cst_27 : f32 to vector<2x32xf32>
      %c0_28 = arith.constant 0 : index
      %c0_29 = arith.constant 0 : index
      %23 = vector.load %arg15[%c0_28, %c0_29] : memref<2x32xf32, #tpu.memory_space<vmem>>, vector<2x32xf32>
      tpu.vector_store %arg15[%c0_28, %c0_29], %22 {strides = array<i32>} : memref<2x32xf32, #tpu.memory_space<vmem>>, vector<2x32xf32>,
      %c0_i32_30 = arith.constant 0 : i32
      %24 = vector.broadcast %c0_i32_30 : i32 to vector<1x1xi32>
      %c0_31 = arith.constant 0 : index
      %c0_32 = arith.constant 0 : index
      %25 = vector.load %arg16[%c0_31, %c0_32] : memref<1x1xi32, #tpu.memory_space<vmem>>, vector<1x1xi32>
      tpu.vector_store %arg16[%c0_31, %c0_32], %24 {strides = array<i32>} : memref<1x1xi32, #tpu.memory_space<vmem>>, vector<1x1xi32>,
    } else {
    }
    %c0 = arith.constant 0 : index
    %3 = memref.load %arg17[%c0] : memref<1xi32, #tpu.memory_space<smem>>
    %c0_i32_1 = arith.constant 0 : i32
    %4 = arith.cmpi eq, %3, %c0_i32_1 : i32
    %5 = arith.extui %4 : i1 to i32
    %c0_i32_2 = arith.constant 0 : i32
    %6 = arith.cmpi ne, %5, %c0_i32_2 : i32
    scf.if %6 {
      %c0_3 = arith.constant 0 : index
      %c0_4 = arith.constant 0 : index
      %7 = vector.load %arg1[%c0_3, %c0_4] : memref<8x8xf32, #tpu.memory_space<vmem>>, vector<8x8xf32>
      %c0_5 = arith.constant 0 : index
      %c0_6 = arith.constant 0 : index
      %8 = vector.load %arg2[%c0_5, %c0_6] : memref<64x32xf32, #tpu.memory_space<vmem>>, vector<64x32xf32>
      %c0_7 = arith.constant 0 : index
      %c0_8 = arith.constant 0 : index
      %9 = vector.load %arg3[%c0_7, %c0_8] : memref<64x32xf32, #tpu.memory_space<vmem>>, vector<64x32xf32>
      %c0_9 = arith.constant 0 : index
      %c0_10 = arith.constant 0 : index
      %10 = vector.load %arg4[%c0_9, %c0_10] : memref<8x64xf32, #tpu.memory_space<vmem>>, vector<8x64xf32>
      %c0_11 = arith.constant 0 : index
      %c0_12 = arith.constant 0 : index
      %11 = vector.load %arg5[%c0_11, %c0_12] : memref<8x32xf32, #tpu.memory_space<vmem>>, vector<8x32xf32>
      %c0_13 = arith.constant 0 : index
      %c0_14 = arith.constant 0 : index
      %12 = vector.load %arg6[%c0_13, %c0_14] : memref<2x64xf32, #tpu.memory_space<vmem>>, vector<2x64xf32>
      %c0_15 = arith.constant 0 : index
      %c0_16 = arith.constant 0 : index
      %13 = vector.load %arg7[%c0_15, %c0_16] : memref<2x64xf32, #tpu.memory_space<vmem>>, vector<2x64xf32>
      %c0_17 = arith.constant 0 : index
      %c0_18 = arith.constant 0 : index
      %14 = vector.load %arg8[%c0_17, %c0_18] : memref<2x64xf32, #tpu.memory_space<vmem>>, vector<2x64xf32>
      %c0_19 = arith.constant 0 : index
      %c0_20 = arith.constant 0 : index
      %15 = vector.load %arg9[%c0_19, %c0_20] : memref<2x64xf32, #tpu.memory_space<vmem>>, vector<2x64xf32>
      %c0_21 = arith.constant 0 : index
      %c0_22 = arith.constant 0 : index
      %16 = vector.load %arg10[%c0_21, %c0_22] : memref<2x8xf32, #tpu.memory_space<vmem>>, vector<2x8xf32>
      %c0_23 = arith.constant 0 : index
      %c0_24 = arith.constant 0 : index
      %17 = vector.load %arg11[%c0_23, %c0_24] : memref<2x8xf32, #tpu.memory_space<vmem>>, vector<2x8xf32>
      %c0_25 = arith.constant 0 : index
      %c0_26 = arith.constant 0 : index
      %18 = vector.load %arg12[%c0_25, %c0_26] : memref<2x32xf32, #tpu.memory_space<vmem>>, vector<2x32xf32>
      %c0_27 = arith.constant 0 : index
      %c0_28 = arith.constant 0 : index
      %19 = vector.load %arg13[%c0_27, %c0_28] : memref<2x32xf32, #tpu.memory_space<vmem>>, vector<2x32xf32>
      %cst = arith.constant dense<0.000000e+00> : vector<2x8xf32>
      %20 = tpu.matmul %17, %7, %cst {dimension_numbers = #tpu.dot_dimension_numbers<[1], [1], [0], [0], [0, 0, 1, 0], [], []>, precision = #tpu.contract_precision<fp32>} : vector<2x8xf32>, vector<8x8xf32>, vector<2x8xf32> -> vector<2x8xf32>
      %cst_29 = arith.constant 1.250000e-01 : f32
      %21 = vector.broadcast %cst_29 : f32 to vector<2x8xf32>
      %22 = arith.mulf %20, %21 : vector<2x8xf32>
      %23 = arith.divf %22, %16 : vector<2x8xf32>
      %cst_30 = arith.constant 1.250000e-02 : f32
      %24 = vector.broadcast %cst_30 : f32 to vector<2x8xf32>
      %25 = arith.addf %24, %22 : vector<2x8xf32>
      %26 = tpu.concatenate %23, %25 in 0 : vector<2x8xf32>, vector<2x8xf32> -> vector<4x8xf32>
      %cst_31 = arith.constant dense<0.000000e+00> : vector<4x64xf32>
      %27 = tpu.matmul %26, %10, %cst_31 {dimension_numbers = #tpu.dot_dimension_numbers<[1], [0], [0], [1], [0, 0, 1, 1], [], []>, precision = #tpu.contract_precision<fp32>} : vector<4x8xf32>, vector<8x64xf32>, vector<4x64xf32> -> vector<4x64xf32>
      %28 = vector.extract_strided_slice %27 {offsets = [0, 0], sizes = [2, 64], strides = [1, 1]} : vector<4x64xf32> to vector<2x64xf32>
      %29 = vector.extract_strided_slice %27 {offsets = [2, 0], sizes = [2, 64], strides = [1, 1]} : vector<4x64xf32> to vector<2x64xf32>
      %30 = tpu.concatenate %18, %19 in 0 : vector<2x32xf32>, vector<2x32xf32> -> vector<4x32xf32>
      %cst_32 = arith.constant dense<0.000000e+00> : vector<4x64xf32>
      %31 = tpu.matmul %30, %8, %cst_32 {dimension_numbers = #tpu.dot_dimension_numbers<[1], [1], [0], [0], [0, 0, 1, 0], [], []>} : vector<4x32xf32>, vector<64x32xf32>, vector<4x64xf32> -> vector<4x64xf32>
      %cst_33 = arith.constant dense<0.000000e+00> : vector<4x64xf32>
      %32 = tpu.matmul %30, %9, %cst_33 {dimension_numbers = #tpu.dot_dimension_numbers<[1], [1], [0], [0], [0, 0, 1, 0], [], []>} : vector<4x32xf32>, vector<64x32xf32>, vector<4x64xf32> -> vector<4x64xf32>
      %33 = vector.extract_strided_slice %31 {offsets = [0, 0], sizes = [2, 64], strides = [1, 1]} : vector<4x64xf32> to vector<2x64xf32>
      %34 = vector.extract_strided_slice %32 {offsets = [2, 0], sizes = [2, 64], strides = [1, 1]} : vector<4x64xf32> to vector<2x64xf32>
      %35 = arith.subf %33, %34 : vector<2x64xf32>
      %36 = vector.extract_strided_slice %32 {offsets = [0, 0], sizes = [2, 64], strides = [1, 1]} : vector<4x64xf32> to vector<2x64xf32>
      %37 = vector.extract_strided_slice %31 {offsets = [2, 0], sizes = [2, 64], strides = [1, 1]} : vector<4x64xf32> to vector<2x64xf32>
      %38 = arith.addf %36, %37 : vector<2x64xf32>
      %39 = arith.subf %12, %35 : vector<2x64xf32>
      %40 = arith.mulf %28, %14 : vector<2x64xf32>
      %41 = arith.addf %39, %40 : vector<2x64xf32>
      %42 = arith.subf %13, %38 : vector<2x64xf32>
      %43 = arith.mulf %28, %15 : vector<2x64xf32>
      %44 = arith.addf %42, %43 : vector<2x64xf32>
      %45 = tpu.reciprocal %25 {approx = true} : vector<2x8xf32> -> vector<2x8xf32>
      %cst_34 = arith.constant dense<0.000000e+00> : vector<2x8xf32>
      %46 = tpu.matmul %45, %7, %cst_34 {dimension_numbers = #tpu.dot_dimension_numbers<[1], [0], [0], [1], [0, 0, 1, 1], [], []>, precision = #tpu.contract_precision<fp32>} : vector<2x8xf32>, vector<8x8xf32>, vector<2x8xf32> -> vector<2x8xf32>
      %47 = tpu.reciprocal %46 {approx = true} : vector<2x8xf32> -> vector<2x8xf32>
      %cst_35 = arith.constant 1.000000e+00 : f32
      %48 = vector.broadcast %cst_35 : f32 to vector<2x8xf32>
      %49 = arith.mulf %48, %47 : vector<2x8xf32>
      %cst_36 = arith.constant dense<0.000000e+00> : vector<2x32xf32>
      %50 = tpu.matmul %49, %11, %cst_36 {dimension_numbers = #tpu.dot_dimension_numbers<[1], [0], [0], [1], [0, 0, 1, 1], [], []>, precision = #tpu.contract_precision<fp32>} : vector<2x8xf32>, vector<8x32xf32>, vector<2x32xf32> -> vector<2x32xf32>
      %51 = tpu.reciprocal %29 {approx = true} : vector<2x64xf32> -> vector<2x64xf32>
      %52 = arith.mulf %41, %51 : vector<2x64xf32>
      %53 = arith.mulf %44, %51 : vector<2x64xf32>
      %54 = tpu.concatenate %52, %53 in 0 : vector<2x64xf32>, vector<2x64xf32> -> vector<4x64xf32>
      %cst_37 = arith.constant dense<0.000000e+00> : vector<4x32xf32>
      %55 = tpu.matmul %54, %8, %cst_37 {dimension_numbers = #tpu.dot_dimension_numbers<[1], [0], [0], [1], [0, 0, 1, 1], [], []>} : vector<4x64xf32>, vector<64x32xf32>, vector<4x32xf32> -> vector<4x32xf32>
      %cst_38 = arith.constant dense<0.000000e+00> : vector<4x32xf32>
      %56 = tpu.matmul %54, %9, %cst_38 {dimension_numbers = #tpu.dot_dimension_numbers<[1], [0], [0], [1], [0, 0, 1, 1], [], []>} : vector<4x64xf32>, vector<64x32xf32>, vector<4x32xf32> -> vector<4x32xf32>
      %57 = vector.extract_strided_slice %55 {offsets = [0, 0], sizes = [2, 32], strides = [1, 1]} : vector<4x32xf32> to vector<2x32xf32>
      %58 = vector.extract_strided_slice %56 {offsets = [2, 0], sizes = [2, 32], strides = [1, 1]} : vector<4x32xf32> to vector<2x32xf32>
      %59 = arith.addf %57, %58 : vector<2x32xf32>
      %60 = vector.extract_strided_slice %55 {offsets = [2, 0], sizes = [2, 32], strides = [1, 1]} : vector<4x32xf32> to vector<2x32xf32>
      %61 = vector.extract_strided_slice %56 {offsets = [0, 0], sizes = [2, 32], strides = [1, 1]} : vector<4x32xf32> to vector<2x32xf32>
      %62 = arith.subf %60, %61 : vector<2x32xf32>
      %63 = arith.mulf %50, %59 : vector<2x32xf32>
      %64 = arith.addf %18, %63 : vector<2x32xf32>
      %65 = arith.mulf %50, %62 : vector<2x32xf32>
      %66 = arith.addf %19, %65 : vector<2x32xf32>
      %67 = tpu.reciprocal %50 {approx = true} : vector<2x32xf32> -> vector<2x32xf32>
      %cst_39 = arith.constant 2.000000e+00 : f32
      %68 = vector.broadcast %cst_39 : f32 to vector<2x32xf32>
      %69 = arith.mulf %68, %67 : vector<2x32xf32>
      %70 = arith.mulf %64, %69 : vector<2x32xf32>
      %71 = arith.mulf %66, %69 : vector<2x32xf32>
      %cst_40 = arith.constant 0.353553385 : f32
      %72 = vector.broadcast %cst_40 : f32 to vector<2x32xf32>
      %73 = arith.mulf %70, %72 : vector<2x32xf32>
      %cst_41 = arith.constant 0.353553385 : f32
      %74 = vector.broadcast %cst_41 : f32 to vector<2x32xf32>
      %75 = arith.mulf %71, %74 : vector<2x32xf32>
      %76 = arith.addf %73, %75 : vector<2x32xf32>
      %cst_42 = arith.constant 0.353553385 : f32
      %77 = vector.broadcast %cst_42 : f32 to vector<2x32xf32>
      %78 = arith.mulf %70, %77 : vector<2x32xf32>
      %cst_43 = arith.constant -0.353553385 : f32
      %79 = vector.broadcast %cst_43 : f32 to vector<2x32xf32>
      %80 = arith.mulf %71, %79 : vector<2x32xf32>
      %81 = arith.addf %78, %80 : vector<2x32xf32>
      %cst_44 = arith.constant -0.353553385 : f32
      %82 = vector.broadcast %cst_44 : f32 to vector<2x32xf32>
      %83 = arith.mulf %70, %82 : vector<2x32xf32>
      %cst_45 = arith.constant 0.353553385 : f32
      %84 = vector.broadcast %cst_45 : f32 to vector<2x32xf32>
      %85 = arith.mulf %71, %84 : vector<2x32xf32>
      %86 = arith.addf %83, %85 : vector<2x32xf32>
      %cst_46 = arith.constant -0.353553385 : f32
      %87 = vector.broadcast %cst_46 : f32 to vector<2x32xf32>
      %88 = arith.mulf %70, %87 : vector<2x32xf32>
      %cst_47 = arith.constant -0.353553385 : f32
      %89 = vector.broadcast %cst_47 : f32 to vector<2x32xf32>
      %90 = arith.mulf %71, %89 : vector<2x32xf32>
      %91 = arith.addf %88, %90 : vector<2x32xf32>
      %92 = math.absf %76 : vector<2x32xf32>
      %93 = math.absf %81 : vector<2x32xf32>
      %94 = arith.maximumf %92, %93 : vector<2x32xf32>
      %95 = math.absf %86 : vector<2x32xf32>
      %96 = arith.maximumf %94, %95 : vector<2x32xf32>
      %97 = math.absf %91 : vector<2x32xf32>
      %98 = arith.maximumf %96, %97 : vector<2x32xf32>
      %99 = vector.shape_cast %98 : vector<2x32xf32> to vector<1x2x32xf32>
      %cst_48 = arith.constant dense<0xFF800000> : vector<1xf32>
      %100 = vector.multi_reduction <maximumf>, %99, %cst_48 [1, 2] : vector<1x2x32xf32> to vector<1xf32>
      %101 = vector.shape_cast %100 : vector<1xf32> to vector<1x1x1xf32>
      %102 = vector.extract %101[0, 0, 0] : f32 from vector<1x1x1xf32>
      %cst_49 = arith.constant 0.000000e+00 : f32
      %103 = vector.broadcast %cst_49 : f32 to vector<2x32xf32>
      %cst_50 = arith.constant 0.000000e+00 : f32
      %104 = vector.broadcast %cst_50 : f32 to vector<2x32xf32>
      %cst_51 = arith.constant 0.000000e+00 : f32
      %105 = vector.broadcast %cst_51 : f32 to vector<2x32xf32>
      %106 = vector.broadcast %102 : f32 to vector<2x32xf32>
      %107 = arith.subf %76, %106 : vector<2x32xf32>
      %108 = math.exp %107 : vector<2x32xf32>
      %109 = arith.addf %103, %108 : vector<2x32xf32>
      %cst_52 = arith.constant 0.353553385 : f32
      %110 = vector.broadcast %cst_52 : f32 to vector<2x32xf32>
      %111 = arith.mulf %110, %108 : vector<2x32xf32>
      %112 = arith.addf %104, %111 : vector<2x32xf32>
      %cst_53 = arith.constant 0.353553385 : f32
      %113 = vector.broadcast %cst_53 : f32 to vector<2x32xf32>
      %114 = arith.mulf %113, %108 : vector<2x32xf32>
      %115 = arith.addf %105, %114 : vector<2x32xf32>
      %116 = vector.broadcast %102 : f32 to vector<2x32xf32>
      %117 = arith.subf %81, %116 : vector<2x32xf32>
      %118 = math.exp %117 : vector<2x32xf32>
      %119 = arith.addf %109, %118 : vector<2x32xf32>
      %cst_54 = arith.constant 0.353553385 : f32
      %120 = vector.broadcast %cst_54 : f32 to vector<2x32xf32>
      %121 = arith.mulf %120, %118 : vector<2x32xf32>
      %122 = arith.addf %112, %121 : vector<2x32xf32>
      %cst_55 = arith.constant -0.353553385 : f32
      %123 = vector.broadcast %cst_55 : f32 to vector<2x32xf32>
      %124 = arith.mulf %123, %118 : vector<2x32xf32>
      %125 = arith.addf %115, %124 : vector<2x32xf32>
      %126 = vector.broadcast %102 : f32 to vector<2x32xf32>
      %127 = arith.subf %86, %126 : vector<2x32xf32>
      %128 = math.exp %127 : vector<2x32xf32>
      %129 = arith.addf %119, %128 : vector<2x32xf32>
      %cst_56 = arith.constant -0.353553385 : f32
      %130 = vector.broadcast %cst_56 : f32 to vector<2x32xf32>
      %131 = arith.mulf %130, %128 : vector<2x32xf32>
      %132 = arith.addf %122, %131 : vector<2x32xf32>
      %cst_57 = arith.constant 0.353553385 : f32
      %133 = vector.broadcast %cst_57 : f32 to vector<2x32xf32>
      %134 = arith.mulf %133, %128 : vector<2x32xf32>
      %135 = arith.addf %125, %134 : vector<2x32xf32>
      %136 = vector.broadcast %102 : f32 to vector<2x32xf32>
      %137 = arith.subf %91, %136 : vector<2x32xf32>
      %138 = math.exp %137 : vector<2x32xf32>
      %139 = arith.addf %129, %138 : vector<2x32xf32>
      %cst_58 = arith.constant -0.353553385 : f32
      %140 = vector.broadcast %cst_58 : f32 to vector<2x32xf32>
      %141 = arith.mulf %140, %138 : vector<2x32xf32>
      %142 = arith.addf %132, %141 : vector<2x32xf32>
      %cst_59 = arith.constant -0.353553385 : f32
      %143 = vector.broadcast %cst_59 : f32 to vector<2x32xf32>
      %144 = arith.mulf %143, %138 : vector<2x32xf32>
      %145 = arith.addf %135, %144 : vector<2x32xf32>
      %cst_60 = arith.constant dense<0.000000e+00> : vector<2x8xf32>
      %146 = tpu.matmul %139, %11, %cst_60 {dimension_numbers = #tpu.dot_dimension_numbers<[1], [1], [0], [0], [0, 0, 1, 0], [], []>, precision = #tpu.contract_precision<fp32>} : vector<2x32xf32>, vector<8x32xf32>, vector<2x8xf32> -> vector<2x8xf32>
      %147 = tpu.reciprocal %146 {approx = true} : vector<2x8xf32> -> vector<2x8xf32>
      %cst_61 = arith.constant dense<0.000000e+00> : vector<2x32xf32>
      %148 = tpu.matmul %147, %11, %cst_61 {dimension_numbers = #tpu.dot_dimension_numbers<[1], [0], [0], [1], [0, 0, 1, 1], [], []>, precision = #tpu.contract_precision<fp32>} : vector<2x8xf32>, vector<8x32xf32>, vector<2x32xf32> -> vector<2x32xf32>
      %149 = arith.mulf %142, %148 : vector<2x32xf32>
      %150 = arith.mulf %145, %148 : vector<2x32xf32>
      %151 = arith.mulf %149, %149 : vector<2x32xf32>
      %152 = arith.mulf %150, %150 : vector<2x32xf32>
      %153 = arith.addf %151, %152 : vector<2x32xf32>
      %cst_62 = arith.constant dense<0.000000e+00> : vector<2x8xf32>
      %154 = tpu.matmul %153, %11, %cst_62 {dimension_numbers = #tpu.dot_dimension_numbers<[1], [1], [0], [0], [0, 0, 1, 0], [], []>, precision = #tpu.contract_precision<fp32>} : vector<2x32xf32>, vector<8x32xf32>, vector<2x8xf32> -> vector<2x8xf32>
      %cst_63 = arith.constant 1.000000e+00 : f32
      %155 = vector.broadcast %cst_63 : f32 to vector<2x8xf32>
      %156 = arith.mulf %154, %155 : vector<2x8xf32>
      %cst_64 = arith.constant 1.000000e+00 : f32
      %157 = vector.broadcast %cst_64 : f32 to vector<2x8xf32>
      %158 = arith.subf %157, %156 : vector<2x8xf32>
      %c0_65 = arith.constant 0 : index
      %c0_66 = arith.constant 0 : index
      %159 = vector.load %arg8[%c0_65, %c0_66] : memref<2x64xf32, #tpu.memory_space<vmem>>, vector<2x64xf32>
      tpu.vector_store %arg8[%c0_65, %c0_66], %41 {strides = array<i32>} : memref<2x64xf32, #tpu.memory_space<vmem>>, vector<2x64xf32>,
      %c0_67 = arith.constant 0 : index
      %c0_68 = arith.constant 0 : index
      %160 = vector.load %arg9[%c0_67, %c0_68] : memref<2x64xf32, #tpu.memory_space<vmem>>, vector<2x64xf32>
      tpu.vector_store %arg9[%c0_67, %c0_68], %44 {strides = array<i32>} : memref<2x64xf32, #tpu.memory_space<vmem>>, vector<2x64xf32>,
      %c0_69 = arith.constant 0 : index
      %c0_70 = arith.constant 0 : index
      %161 = vector.load %arg10[%c0_69, %c0_70] : memref<2x8xf32, #tpu.memory_space<vmem>>, vector<2x8xf32>
      tpu.vector_store %arg10[%c0_69, %c0_70], %25 {strides = array<i32>} : memref<2x8xf32, #tpu.memory_space<vmem>>, vector<2x8xf32>,
      %c0_71 = arith.constant 0 : index
      %c0_72 = arith.constant 0 : index
      %162 = vector.load %arg11[%c0_71, %c0_72] : memref<2x8xf32, #tpu.memory_space<vmem>>, vector<2x8xf32>
      tpu.vector_store %arg11[%c0_71, %c0_72], %158 {strides = array<i32>} : memref<2x8xf32, #tpu.memory_space<vmem>>, vector<2x8xf32>,
      %c0_73 = arith.constant 0 : index
      %c0_74 = arith.constant 0 : index
      %163 = vector.load %arg12[%c0_73, %c0_74] : memref<2x32xf32, #tpu.memory_space<vmem>>, vector<2x32xf32>
      tpu.vector_store %arg12[%c0_73, %c0_74], %149 {strides = array<i32>} : memref<2x32xf32, #tpu.memory_space<vmem>>, vector<2x32xf32>,
      %c0_75 = arith.constant 0 : index
      %c0_76 = arith.constant 0 : index
      %164 = vector.load %arg13[%c0_75, %c0_76] : memref<2x32xf32, #tpu.memory_space<vmem>>, vector<2x32xf32>
      tpu.vector_store %arg13[%c0_75, %c0_76], %150 {strides = array<i32>} : memref<2x32xf32, #tpu.memory_space<vmem>>, vector<2x32xf32>,
      %c0_77 = arith.constant 0 : index
      %c0_78 = arith.constant 0 : index
      %165 = vector.load %arg14[%c0_77, %c0_78] : memref<2x32xf32, #tpu.memory_space<vmem>>, vector<2x32xf32>
      tpu.vector_store %arg14[%c0_77, %c0_78], %64 {strides = array<i32>} : memref<2x32xf32, #tpu.memory_space<vmem>>, vector<2x32xf32>,
      %c0_79 = arith.constant 0 : index
      %c0_80 = arith.constant 0 : index
      %166 = vector.load %arg15[%c0_79, %c0_80] : memref<2x32xf32, #tpu.memory_space<vmem>>, vector<2x32xf32>
      tpu.vector_store %arg15[%c0_79, %c0_80], %66 {strides = array<i32>} : memref<2x32xf32, #tpu.memory_space<vmem>>, vector<2x32xf32>,
      %c1_i32 = arith.constant 1 : i32
      %167 = arith.addi %arg0, %c1_i32 : i32
      %168 = vector.broadcast %167 : i32 to vector<1x1xi32>
      %c0_81 = arith.constant 0 : index
      %c0_82 = arith.constant 0 : index
      %169 = vector.load %arg16[%c0_81, %c0_82] : memref<1x1xi32, #tpu.memory_space<vmem>>, vector<1x1xi32>
      tpu.vector_store %arg16[%c0_81, %c0_82], %168 {strides = array<i32>} : memref<1x1xi32, #tpu.memory_space<vmem>>, vector<1x1xi32>,
      %170 = arith.subf %158, %17 : vector<2x8xf32>
      %171 = math.absf %170 : vector<2x8xf32>
      %172 = math.absf %17 : vector<2x8xf32>
      %cst_83 = arith.constant 9.99999974E-6 : f32
      %173 = vector.broadcast %cst_83 : f32 to vector<2x8xf32>
      %174 = arith.mulf %173, %172 : vector<2x8xf32>
      %cst_84 = arith.constant 9.99999993E-9 : f32
      %175 = vector.broadcast %cst_84 : f32 to vector<2x8xf32>
      %176 = arith.addf %175, %174 : vector<2x8xf32>
      %177 = arith.subf %171, %176 : vector<2x8xf32>
      %178 = vector.shape_cast %177 : vector<2x8xf32> to vector<1x2x8xf32>
      %cst_85 = arith.constant dense<0xFF800000> : vector<1xf32>
      %179 = vector.multi_reduction <maximumf>, %178, %cst_85 [1, 2] : vector<1x2x8xf32> to vector<1xf32>
      %180 = vector.shape_cast %179 : vector<1xf32> to vector<1x1x1xf32>
      %181 = vector.extract %180[0, 0, 0] : f32 from vector<1x1x1xf32>
      %cst_86 = arith.constant 0.000000e+00 : f32
      %182 = arith.cmpf ole, %181, %cst_86 : f32
      %183 = arith.extui %182 : i1 to i32
      %c0_87 = arith.constant 0 : index
      %184 = memref.load %arg17[%c0_87] : memref<1xi32, #tpu.memory_space<smem>>
      memref.store %183, %arg17[%c0_87] : memref<1xi32, #tpu.memory_space<smem>>
    } else {
    }
    return
  }
  func.func @transform_0(%arg0: i32) -> (i32, i32) {
    %c0_i32 = arith.constant 0 : i32
    %c0_i32_0 = arith.constant 0 : i32
    %c0_i32_1 = arith.constant 0 : i32
    return %c0_i32, %c0_i32_0 : i32, i32
  }
  func.func @transform_1(%arg0: i32) -> (i32, i32) {
    %c0_i32 = arith.constant 0 : i32
    %c0_i32_0 = arith.constant 0 : i32
    %c0_i32_1 = arith.constant 0 : i32
    return %c0_i32, %c0_i32_0 : i32, i32
  }
  func.func @transform_2(%arg0: i32) -> (i32, i32) {
    %c0_i32 = arith.constant 0 : i32
    %c0_i32_0 = arith.constant 0 : i32
    %c0_i32_1 = arith.constant 0 : i32
    return %c0_i32, %c0_i32_0 : i32, i32
  }
  func.func @transform_3(%arg0: i32) -> (i32, i32) {
    %c0_i32 = arith.constant 0 : i32
    %c0_i32_0 = arith.constant 0 : i32
    %c0_i32_1 = arith.constant 0 : i32
    return %c0_i32, %c0_i32_0 : i32, i32
  }
  func.func @transform_4(%arg0: i32) -> (i32, i32) {
    %c0_i32 = arith.constant 0 : i32
    %c0_i32_0 = arith.constant 0 : i32
    %c0_i32_1 = arith.constant 0 : i32
    return %c0_i32, %c0_i32_0 : i32, i32
  }
  func.func @transform_5(%arg0: i32) -> (i32, i32) {
    %c0_i32 = arith.constant 0 : i32
    %c0_i32_0 = arith.constant 0 : i32
    %c0_i32_1 = arith.constant 0 : i32
    return %c0_i32, %c0_i32_0 : i32, i32
  }
  func.func @transform_6(%arg0: i32) -> (i32, i32) {
    %c0_i32 = arith.constant 0 : i32
    %c0_i32_0 = arith.constant 0 : i32
    %c0_i32_1 = arith.constant 0 : i32
    return %c0_i32, %c0_i32_0 : i32, i32
  }
  func.func @transform_7(%arg0: i32) -> (i32, i32) {
    %c0_i32 = arith.constant 0 : i32
    %c0_i32_0 = arith.constant 0 : i32
    %c0_i32_1 = arith.constant 0 : i32
    return %c0_i32, %c0_i32_0 : i32, i32
  }
  func.func @transform_8(%arg0: i32) -> (i32, i32) {
    %c0_i32 = arith.constant 0 : i32
    %c0_i32_0 = arith.constant 0 : i32
    %c0_i32_1 = arith.constant 0 : i32
    return %c0_i32, %c0_i32_0 : i32, i32
  }
  func.func @transform_9(%arg0: i32) -> (i32, i32) {
    %c0_i32 = arith.constant 0 : i32
    %c0_i32_0 = arith.constant 0 : i32
    %c0_i32_1 = arith.constant 0 : i32
    return %c0_i32, %c0_i32_0 : i32, i32
  }
  func.func @transform_10(%arg0: i32) -> (i32, i32) {
    %c0_i32 = arith.constant 0 : i32
    %c0_i32_0 = arith.constant 0 : i32
    %c0_i32_1 = arith.constant 0 : i32
    return %c0_i32, %c0_i32_0 : i32, i32
  }
  func.func @transform_11(%arg0: i32) -> (i32, i32) {
    %c0_i32 = arith.constant 0 : i32
    %c0_i32_0 = arith.constant 0 : i32
    %c0_i32_1 = arith.constant 0 : i32
    return %c0_i32, %c0_i32_0 : i32, i32
  }
  func.func @transform_12(%arg0: i32) -> (i32, i32) {
    %c0_i32 = arith.constant 0 : i32
    %c0_i32_0 = arith.constant 0 : i32
    %c0_i32_1 = arith.constant 0 : i32
    return %c0_i32, %c0_i32_0 : i32, i32
  }
  func.func @transform_13(%arg0: i32) -> (i32, i32) {
    %c0_i32 = arith.constant 0 : i32
    %c0_i32_0 = arith.constant 0 : i32
    %c0_i32_1 = arith.constant 0 : i32
    return %c0_i32, %c0_i32_0 : i32, i32
  }
  func.func @transform_14(%arg0: i32) -> (i32, i32) {
    %c0_i32 = arith.constant 0 : i32
    %c0_i32_0 = arith.constant 0 : i32
    %c0_i32_1 = arith.constant 0 : i32
    return %c0_i32, %c0_i32_0 : i32, i32
  }
  func.func @transform_15(%arg0: i32) -> (i32, i32) {
    %c0_i32 = arith.constant 0 : i32
    %c0_i32_0 = arith.constant 0 : i32
    %c0_i32_1 = arith.constant 0 : i32
    return %c0_i32, %c0_i32_0 : i32, i32
  }
}

</mosaic_0001>

<bundles_post_ra>
// kernel: tpu_custom_call.1
= control target key start
LH: loop header
LB: loop body
LE: loop exit
PB: predicated region body
PF: predicated region fallthrough
CT: control target
= control target key end

     0   :  { %21 = vsyncpa [#allocation4], 0  ;;  %s5976_s0 = inlined_call_operand.vmem [shape: f32[8,8], index: 0, kind: input, shape index: {}]   ;;  %s5977_s1 = inlined_call_operand.vmem [shape: f32[64,32], index: 1, kind: input, shape index: {}]   ;;  %s5978_s2 = inlined_call_operand.vmem [shape: f32[64,32], index: 2, kind: input, shape index: {}]   ;;  %s5979_s3 = inlined_call_operand.vmem [shape: f32[8,64], index: 3, kind: input, shape index: {}]   ;;  %s5980_s4 = inlined_call_operand.vmem [shape: f32[8,32], index: 4, kind: input, shape index: {}]   ;;  %s5981_s5 = inlined_call_operand.vmem [shape: f32[2,64], index: 5, kind: input, shape index: {}]   ;;  %s5982_s6 = inlined_call_operand.vmem [shape: f32[2,64], index: 6, kind: input, shape index: {}]   ;;  %s5983_s7 = inlined_call_operand.hbm [shape: f32[2,64], index: 7, kind: output, shape index: {0}]   ;;  %s5984_s8 = inlined_call_operand.hbm [shape: f32[2,64], index: 8, kind: output, shape index: {1}]   ;;  %s5985_s9 = inlined_call_operand.hbm [shape: f32[2,8], index: 9, kind: output, shape index: {2}]   ;;  %s5986_s10 = inlined_call_operand.hbm [shape: f32[2,8], index: 10, kind: output, shape index: {3}]   ;;  %s5987_s11 = inlined_call_operand.hbm [shape: f32[2,32], index: 11, kind: output, shape index: {4}]   ;;  %s5988_s12 = inlined_call_operand.hbm [shape: f32[2,32], index: 12, kind: output, shape index: {5}]   ;;  %s5989_s13 = inlined_call_operand.hbm [shape: f32[2,32], index: 13, kind: output, shape index: {6}]   ;;  %s5990_s14 = inlined_call_operand.hbm [shape: f32[2,32], index: 14, kind: output, shape index: {7}]   ;;  %s5991_s15 = inlined_call_operand.hbm [shape: s32[1,1], index: 15, kind: output, shape index: {8}]  }
   0x1   :  { %22 = vsyncpa [#allocation6], 0 }
   0x2   :  { %23 = vsyncpa [#allocation9], 0 }
   0x3   :  { %24 = vsyncpa [#allocation12], 0 }
   0x4   :  { %25 = vsyncpa [#allocation15], 0  ;;  %s5382_s18 = smov 0  }
   0x5 LB: > { %s5388_s19 = sadd.s32 4294967295, %s5283_s18   ;;  %p4343_p0 = scmp.ge.s32.totalorder %s5283_s18, 1  ;;  %s5283_s18 = sphi %s5382_s18, %s31_s18  }
   0x6   : > { %p404_p1 = scmp.lt.s32.totalorder %s5283_s18, 5 }
   0x8   : > { %p405_p2 = pnand %p4343_p0, %p404_p1 }
   0x9   : > { %p4344_p3 = scmp.ne.s32.totalorder (!%p405_p2), %s5388_s19, 0 }
   0xa   : > { %408 = sbr.rel (%p405_p2) target bundleno = 2427 (0x97b), region = 48 }
  0x11   : > { %445 = sbr.rel (%p4344_p3) target bundleno = 24 (0x18), region = 52  ;;  %v448_v0 = vld [vmem:[%s5981_s5] sm:$0x3] (!%p4344_p3)  ;;  %vm449_vm0 = vcmask (!%p4344_p3), 517120   ;;  %s5285_s24 = smov (!%p4344_p3), 0   ;;  %vm453_vm1 = vcmask (!%p4344_p3), 58368  }
  0x12   : > { %v451_v1 = vld [vmem:[%s5982_s6] sm:$0x3] (!%p4344_p3)  ;;  %447 = sst [smem:[#allocation2]] (!%p4344_p3), %s5285_s24  ;;  %450 = vst.msk [vmem:[#allocation3] sm:$0x3] (!%p4344_p3), %vm449_vm0, %v448_v0  ;;  %vm456_vm2 = vcmask (!%p4344_p3), 254976  }
  0x13   : > { %452 = vst.msk [vmem:[#allocation5] sm:$0x3] (!%p4344_p3), %vm449_vm0, %v451_v1  ;;  %v5286_v2 = vmov (!%p4344_p3), inf   ;;  %v5287_v3 = vmov (!%p4344_p3), 1.0   ;;  %vm461_vm3 = vcmask (!%p4344_p3), 0   ;;  %v5288_v4 = vmov (!%p4344_p3), 0.0  }
  0x14   : > { %454 = vst.msk [vmem:[#allocation7] sm:$0x3] (!%p4344_p3), %vm453_vm1, %v5286_v2  ;;  %455 = vst.msk [vmem:[#allocation8] sm:$0x3] (!%p4344_p3), %vm453_vm1, %v5287_v3  ;;  %v5289_v5 = vmov (!%p4344_p3), 0  }
  0x15   : > { %457 = vst.msk [vmem:[#allocation10] sm:$0x3] (!%p4344_p3), %vm456_vm2, %v5288_v4  ;;  %458 = vst.msk [vmem:[#allocation11] sm:$0x3] (!%p4344_p3), %vm456_vm2, %v5288_v4 }
  0x16   : > { %459 = vst.msk [vmem:[#allocation13] sm:$0x3] (!%p4344_p3), %vm456_vm2, %v5288_v4  ;;  %460 = vst.msk [vmem:[#allocation14] sm:$0x3] (!%p4344_p3), %vm456_vm2, %v5288_v4 }
  0x17   : > { %462 = vst.msk [vmem:[#allocation16] sm:$0x1] (!%p4344_p3), %vm461_vm3, %v5289_v5 }
  0x18 PF: > { %s463_s25 = sld [smem:[#allocation2]] }
  0x1e   : > { %p4345_p4 = scmp.ne.s32.totalorder %s463_s25, 0 }
  0x1f   : > { %v5402_v6 = vld [vmem:[%s5976_s0] sm:$0xff] (!%p4345_p4)  ;;  %vm495_vm4 = vcmask (!%p4345_p4), 64512   ;;  %v5290_v8 = vmov (!%p4345_p4), 0.0   ;;  %vm5291_vm5 = vmmov (!%p4345_p4), 0   ;;  %v478_v24 = vld [vmem:[%s5978_s2 + $0x8] sm:$0xff] (!%p4345_p4)  ;;  %vm1410_vm6 = vcmask (!%p4345_p4), 261120  }
  0x20   : > { %467 = sbr.rel (%p4345_p4) target bundleno = 2218 (0x8aa), region = 56  ;;  %v5404_v7 = vld [vmem:[#allocation8] sm:$0x3] (!%p4345_p4)  ;;  %4511 = vmatprep.subr.mxu0 (!%p4345_p4), %v5290_v8  ;;  %v500_v9 = vsel (!%p4345_p4), %vm495_vm4, %v5402_v6, 0  ;;  %4513 = vmatprep.mubr.msk.f32.mxu0 (!%p4345_p4), %vm5291_vm5, %v5290_v8  ;;  %v5292_v25 = vmov (!%p4345_p4), 0.0|0.0   ;;  %vm5449_vm7 = vmpackc.low (!%p4345_p4), %vm1410_vm6, %vm1410_vm6  ;;  %v479_v28 = vld [vmem:[%s5978_s2 + $0x10] sm:$0xff] (!%p4345_p4) }
  0x21   : > { %v497_v10 = vsel (!%p4345_p4), %vm495_vm4, %v5404_v7, 0  ;;  %v503_v11 = vand.u32 (!%p4345_p4), 4294901760, %v500_v9  ;;  %4506 = vmatprep.subr.mxu1 (!%p4345_p4), %v5290_v8  ;;  %4508 = vmatprep.mubr.msk.f32.mxu1 (!%p4345_p4), %vm5291_vm5, %v5290_v8  ;;  %v485_v21 = vld [vmem:[%s5979_s3] sm:$0xff] (!%p4345_p4)  ;;  %v480_v29 = vld [vmem:[%s5978_s2 + $0x18] sm:$0xff] (!%p4345_p4)  ;;  %v482_v32 = vld [vmem:[%s5978_s2 + $0x28] sm:$0xff] (!%p4345_p4)  ;;  %vm955_vm8 = vcmask (!%p4345_p4), 1041408  }
  0x22   : > { %v568_v12 = vand.u32 (!%p4345_p4), 4294901760, %v497_v10  ;;  %v5436_v22 = vand.u32 (!%p4345_p4), 4294901760, %v485_v21  ;;  %v477_v23 = vld [vmem:[%s5978_s2] sm:$0xff] (!%p4345_p4)  ;;  %v5465_v30 = vpack.c.bf16 (!%p4345_p4), %v480_v29, %v479_v28  ;;  %v483_v34 = vld [vmem:[%s5978_s2 + $0x30] sm:$0xff] (!%p4345_p4)  ;;  %v484_v35 = vld [vmem:[%s5978_s2 + $0x38] sm:$0xff] (!%p4345_p4)  ;;  %vm4104_vm9 = vcmask (!%p4345_p4), 58368  }
  0x23   : > { %v580_v13 = vsub.f32 (!%p4345_p4), %v500_v9, %v503_v11  ;;  %4507 = vmatpush3.xpose.msra.mxu1 (!%p4345_p4), %v503_v11  ;;  %v5453_v27 = vpack.c.bf16 (!%p4345_p4), %v478_v24, %v477_v23  ;;  %v481_v31 = vld [vmem:[%s5978_s2 + $0x20] sm:$0xff] (!%p4345_p4)  ;;  %v5489_v36 = vpack.c.bf16 (!%p4345_p4), %v484_v35, %v483_v34  ;;  %v5495_v37 = vld [vmem:[#allocation10] sm:$0x3] (!%p4345_p4)  ;;  %v5497_v38 = vld [vmem:[#allocation11] sm:$0x3] (!%p4345_p4)  ;;  %vm4101_vm10 = vcmask (!%p4345_p4), 517120  }
  0x24   : > { %v569_v14 = vsub.f32 (!%p4345_p4), %v497_v10, %v568_v12  ;;  %4536 = vmatprep.subr.mxu1 (!%p4345_p4), %v5290_v8  ;;  %v5477_v33 = vpack.c.bf16 (!%p4345_p4), %v482_v32, %v481_v31  ;;  %v1407_v39 = vrot.slane (!%p4345_p4), %v5497_v38, 6  ;;  %v491_v43 = vld [vmem:[#allocation7] sm:$0x3] (!%p4345_p4)  ;;  %v1038_v50 = vsub.f32 (!%p4345_p4), %v485_v21, %v5436_v22  ;;  %v470_v0 = vld [vmem:[%s5977_s1 + $0x8] sm:$0xff] (!%p4345_p4)  ;;  %v471_v2 = vld [vmem:[%s5977_s1 + $0x10] sm:$0xff] (!%p4345_p4)  ;;  %s4111_s30 = sadd.s32 (!%p4345_p4), 1, %s5388_s19 }
  0x25   : > { %v581_v15 = vand.u32 (!%p4345_p4), 4294901760, %v580_v13  ;;  %5000 = vrcp.f32 (!%p4345_p4), %v491_v43  ;;  %v469_v63 = vld [vmem:[%s5977_s1] sm:$0xff] (!%p4345_p4)  ;;  %v472_v3 = vld [vmem:[%s5977_s1 + $0x18] sm:$0xff] (!%p4345_p4)  ;;  %v474_v9 = vld [vmem:[%s5977_s1 + $0x28] sm:$0xff] (!%p4345_p4)  ;;  %vm2526_vm11 = vcmask (!%p4345_p4), 523264   ;;  %vm2703_vm12 = vcmask (!%p4345_p4), 254976  }
  0x26   : > { %v570_v16 = vand.u32 (!%p4345_p4), 4294901760, %v569_v14  ;;  %v5502_v40 = vsel (!%p4345_p4), %vm955_vm8, %v5495_v37, %v1407_v39  ;;  %v1039_v55 = vand.u32 (!%p4345_p4), 4294901760, %v1038_v50  ;;  %v5535_v1 = vpack.c.bf16 (!%p4345_p4), %v470_v0, %v469_v63  ;;  %v473_v5 = vld [vmem:[%s5977_s1 + $0x20] sm:$0xff] (!%p4345_p4) }
  0x27   : > { %v582_v17 = vsub.f32 %v580_v13, %v581_v15  ;;  %v5549_v4 = vpack.c.bf16 %v472_v3, %v471_v2  ;;  %v5607_v29 = vld [vmem:[%s5980_s4] sm:$0xff]  ;;  %vm4113_vm13 = vcmask 0  }
  0x28   : > { %v571_v18 = vsub.f32 %v569_v14, %v570_v16  ;;  %v1040_v58 = vsub.f32 %v1038_v50, %v1039_v55  ;;  %v5610_v31 = vand.u32 4294901760, %v5607_v29  ;;  %v489_v39 = vld [vmem:[#allocation3] sm:$0x3] }
  0x29   : > { %v583_v19 = vand.u32 4294901760, %v582_v17 }
  0x2a   : > { %v572_v20 = vand.u32 4294901760, %v571_v18  ;;  %v1041_v61 = vand.u32 4294901760, %v1040_v58 }
  0x2b   : > { %4512 = vmatpush3.xpose.msra.mxu0 %v583_v19 }
  0x2c   : > { %4509 = vmatmul.mubr.f32.vlgmr.msra.gmra.mrb[0].mxu1 %v572_v20  ;;  %4516 = vmatprep.subr.mxu0 %v5290_v8 }
  0x2d   : > { %4538 = vmatprep.mubr.msk.f32.mxu1 %vm5291_vm5, %v5290_v8  ;;  %4537 = vmatpush3.msra.mxu1 %v5436_v22 }
  0x2e   : > { %4514 = vmatmul.mubr.f32.vlgmr.msra.gmra.mrb[0].mxu0 %v568_v12  ;;  %4541 = vmatprep.subr.mxu1 %v5290_v8 }
  0x2f   : > { %4517 = vmatpush3.xpose.msra.mxu0 %v580_v13  ;;  %4518 = vmatprep.mubr.msk.f32.mxu0 %vm5291_vm5, %v5290_v8  ;;  %v5001_v48 = vpop.eup %5000  ;;  %v1621_v13 = vand.u32 4294901760, %v5402_v6 }
  0x30   : > { %4521 = vmatprep.subr.mxu0 %v5290_v8 }
  0x31   : > { %v1698_v18 = vsub.f32 %v5402_v6, %v1621_v13 }
  0x33   : > { %v1699_v20 = vand.u32 4294901760, %v1698_v18 }
  0x36   : > { %4519 = vmatmul.mubr.f32.vlgmr.msra.gmra.mrb[0].mxu0 %v569_v14  ;;  %v475_v14 = vld [vmem:[%s5977_s1 + $0x30] sm:$0xff] }
  0x37   : > { %4522 = vmatpush3.xpose.msra.mxu0 %v503_v11  ;;  %4523 = vmatprep.mubr.msk.f32.mxu0 %vm5291_vm5, %v5290_v8 }
  0x38   : > { %4526 = vmatprep.subr.mxu0 %v5290_v8 }
  0x3e   : > { %4524 = vmatmul.mubr.f32.vlgmr.msra.gmra.mrb[0].mxu0 %v570_v16 }
  0x3f   : > { %4527 = vmatpush3.xpose.msra.mxu0 %v581_v15  ;;  %4528 = vmatprep.mubr.msk.f32.mxu0 %vm5291_vm5, %v5290_v8  ;;  %v476_v15 = vld [vmem:[%s5977_s1 + $0x38] sm:$0xff] }
  0x40   : > { %4531 = vmatprep.subr.mxu0 %v5290_v8  ;;  %v5575_v17 = vpack.c.bf16 %v476_v15, %v475_v14 }
  0x46   : > { %4529 = vmatmul.mubr.f32.vlgmr.msra.gmra.mrb[0].mxu0 %v568_v12 }
  0x47   : > { %4532 = vmatpush3.xpose.msra.mxu0 %v503_v11  ;;  %4533 = vmatprep.mubr.msk.f32.mxu0 %vm5291_vm5, %v5290_v8  ;;  %v5561_v11 = vpack.c.bf16 %v474_v9, %v473_v5 }
  0x48   : > { %4808 = vmatprep.subr.bf16.mxu0 %v5292_v25 }
  0x4e   : > { %4534 = vmatmul.mubr.f32.vlgmr.msra.gmra.mrb[0].mxu0 %v568_v12 }
  0x4f   : > { %4601 = vmatprep.mubr.msk.f32.mxu0 %vm5291_vm5, %v5290_v8  ;;  %4811 = vmatpush3.bf16.xpose.msk.msra.mxu0 %vm5449_vm7, %v5453_v27 }
  0x50   : > { %4812 = vmatprep.subr.bf16.mxu0 %v5292_v25 }
  0x57   : > { %4815 = vmatpush3.bf16.xpose.msk.msra.mxu0 %vm5449_vm7, %v5465_v30 }
  0x58   : > { %4816 = vmatprep.subr.bf16.mxu0 %v5292_v25 }
  0x5f   : > { %4819 = vmatpush3.bf16.xpose.msk.msra.mxu0 %vm5449_vm7, %v5477_v33 }
  0x60   : > { %4820 = vmatprep.subr.bf16.mxu0 %v5292_v25 }
  0x67   : > { %4823 = vmatpush3.bf16.xpose.msk.msra.mxu0 %vm5449_vm7, %v5489_v36 }
  0x68   : > { %4634 = vmatprep.subr.mxu0 %v5290_v8 }
  0x6e   : > { %4602 = vmatmul.mubr.msk.f32.vlgmr.msra.gmra.mrb[2].mxu0 %vm1410_vm6, %v5502_v40 }
  0x6f   : > { %4636 = vmatprep.mubr.msk.f32.mxu0 %vm5291_vm5, %v5290_v8  ;;  %4635 = vmatpush3.msra.mxu0 %v5610_v31 }
  0x70   : > { %4639 = vmatprep.subr.mxu0 %v5290_v8 }
  0xff   : > { %v574_v41 = vpop.f32.mrb[0].mxu1 }
 0x100   : > { %v4510_v42 = vpop.f32.mrb[1].mxu1 }
 0x121   : > { %v944_v44 = vpop.f32.mrb[0].mxu0 }
 0x122   : > { %v4848_v45 = vadd.f32 %v944_v44, %v574_v41  ;;  %v4535_v46 = vpop.f32.mrb[1].mxu0 }
 0x123   : > { %v490_v46 = vld [vmem:[#allocation5] sm:$0x3] }
 0x124   : > { %v948_v47 = vmul.f32 0.125, %v4848_v45 }
 0x126   : > { %v951_v49 = vadd.f32 0.0125, %v948_v47  ;;  %v950_v51 = vmul.f32 %v5001_v48, %v948_v47  ;;  %v488_v47 = vld [vmem:[%s5982_s6] sm:$0x3] }
 0x128   : > { %v953_v52 = vrot.slane %v951_v49, 6  ;;  %4105 = vst.msk [vmem:[#allocation7] sm:$0x3] %vm4104_vm9, %v951_v49  ;;  %5002 = vrcp.f32 %v951_v49 }
 0x12a   : > { %v956_v53 = vsel %vm955_vm8, %v950_v51, %v953_v52 }
 0x12b   : > { %v958_v54 = vsel %vm495_vm4, %v956_v53, 0 }
 0x12c   : > { %v1026_v56 = vand.u32 4294901760, %v958_v54 }
 0x12e   : > { %v1027_v57 = vsub.f32 %v958_v54, %v1026_v56 }
 0x130   : > { %v1028_v59 = vand.u32 4294901760, %v1027_v57 }
 0x132   : > { %v1029_v60 = vsub.f32 %v1027_v57, %v1028_v59  ;;  %v5003_v10 = vpop.eup %5002 }
 0x133   : > { %v1618_v12 = vsel %vm495_vm4, %v5003_v10, 0 }
 0x134   : > { %v1030_v62 = vand.u32 4294901760, %v1029_v60  ;;  %v1686_v16 = vand.u32 4294901760, %v1618_v12 }
 0x136   : > { %4539 = vmatmul.mubr.f32.vlgmr.msra.gmra.mrb[2].mxu1 %v1030_v62  ;;  %v1687_v19 = vsub.f32 %v1618_v12, %v1686_v16  ;;  %v5623_v62 = vsub.f32 %v5607_v29, %v5610_v31 }
 0x137   : > { %4542 = vmatpush3.msra.mxu1 %v1041_v61  ;;  %4543 = vmatprep.mubr.msk.f32.mxu1 %vm5291_vm5, %v5290_v8 }
 0x138   : > { %4546 = vmatprep.subr.mxu1 %v5290_v8  ;;  %v1688_v21 = vand.u32 4294901760, %v1687_v19  ;;  %v5627_v2 = vand.u32 4294901760, %v5623_v62 }
 0x13a   : > { %v1689_v23 = vsub.f32 %v1687_v19, %v1688_v21  ;;  %v2150_v9 = vsub.f32 %v5623_v62, %v5627_v2 }
 0x13c   : > { %v1690_v6 = vand.u32 4294901760, %v1689_v23 }
 0x13e   : > { %4544 = vmatmul.mubr.f32.vlgmr.msra.gmra.mrb[2].mxu1 %v1026_v56 }
 0x13f   : > { %4547 = vmatpush3.msra.mxu1 %v1038_v50  ;;  %4548 = vmatprep.mubr.msk.f32.mxu1 %vm5291_vm5, %v5290_v8 }
 0x140   : > { %4551 = vmatprep.subr.mxu1 %v5290_v8 }
 0x141   : > { %v1598_v26 = vpop.f32.mrb[2].mxu0 }
 0x142   : > { %v4603_v28 = vpop.f32.mrb[3].mxu0  ;;  %v1603_v35 = vrot.slane %v1598_v26, 2 }
 0x146   : > { %4549 = vmatmul.mubr.f32.vlgmr.msra.gmra.mrb[2].mxu1 %v1027_v57 }
 0x147   : > { %4552 = vmatpush3.msra.mxu1 %v5436_v22  ;;  %4553 = vmatprep.mubr.msk.f32.mxu1 %vm5291_vm5, %v5290_v8 }
 0x148   : > { %4556 = vmatprep.subr.mxu1 %v5290_v8 }
 0x14e   : > { %4554 = vmatmul.mubr.f32.vlgmr.msra.gmra.mrb[2].mxu1 %v1028_v59 }
 0x14f   : > { %4557 = vmatpush3.msra.mxu1 %v1039_v55  ;;  %4558 = vmatprep.mubr.msk.f32.mxu1 %vm5291_vm5, %v5290_v8 }
 0x150   : > { %4561 = vmatprep.subr.mxu1 %v5290_v8 }
 0x156   : > { %4559 = vmatmul.mubr.f32.vlgmr.msra.gmra.mrb[2].mxu1 %v1026_v56 }
 0x157   : > { %4562 = vmatpush3.msra.mxu1 %v5436_v22  ;;  %4563 = vmatprep.mubr.msk.f32.mxu1 %vm5291_vm5, %v5290_v8  ;;  %v1700_v22 = vsub.f32 %v1698_v18, %v1699_v20 }
 0x158   : > { %4792 = vmatprep.subr.bf16.mxu1 %v5292_v25 }
 0x159   : > { %v1701_v24 = vand.u32 4294901760, %v1700_v22 }
 0x15e   : > { %4564 = vmatmul.mubr.f32.vlgmr.msra.gmra.mrb[2].mxu1 %v1026_v56 }
 0x15f   : > { %4795 = vmatpush3.bf16.xpose.msk.msra.mxu1 %vm5449_vm7, %v5535_v1  ;;  %4582 = vmatprep.mubr.msk.f32.mxu1 %vm5291_vm5, %v5290_v8 }
 0x160   : > { %4796 = vmatprep.subr.bf16.mxu1 %v5292_v25 }
 0x167   : > { %4799 = vmatpush3.bf16.xpose.msk.msra.mxu1 %vm5449_vm7, %v5549_v4 }
 0x168   : > { %4800 = vmatprep.subr.bf16.mxu1 %v5292_v25 }
 0x16f   : > { %4803 = vmatpush3.bf16.xpose.msk.msra.mxu1 %vm5449_vm7, %v5561_v11 }
 0x170   : > { %4804 = vmatprep.subr.bf16.mxu1 %v5292_v25 }
 0x177   : > { %4807 = vmatpush3.bf16.xpose.msk.msra.mxu1 %vm5449_vm7, %v5575_v17 }
 0x178   : > { %4604 = vmatprep.subr.mxu1 %v5290_v8 }
 0x17e   : > { %4583 = vmatmul.mubr.msk.f32.vlgmr.msra.gmra.mrb[4].mxu1 %vm1410_vm6, %v5502_v40  ;;  %v487_v40 = vld [vmem:[%s5981_s5] sm:$0x3] }
 0x17f   : > { %4605 = vmatpush3.msra.mxu1 %v1621_v13  ;;  %4606 = vmatprep.mubr.msk.f32.mxu1 %vm5291_vm5, %v5290_v8 }
 0x180   : > { %4609 = vmatprep.subr.mxu1 %v5290_v8 }
 0x182   : > { %4607 = vmatmul.mubr.f32.vlgmr.msra.gmra.mrb[6].mxu1 %v1690_v6 }
 0x183   : > { %4610 = vmatpush3.msra.mxu1 %v1701_v24  ;;  %4611 = vmatprep.mubr.msk.f32.mxu1 %vm5291_vm5, %v5290_v8 }
 0x184   : > { %4614 = vmatprep.subr.mxu1 %v5290_v8 }
 0x18a   : > { %4612 = vmatmul.mubr.f32.vlgmr.msra.gmra.mrb[6].mxu1 %v1686_v16 }
 0x18b   : > { %4615 = vmatpush3.msra.mxu1 %v1698_v18  ;;  %4616 = vmatprep.mubr.msk.f32.mxu1 %vm5291_vm5, %v5290_v8 }
 0x18c   : > { %4619 = vmatprep.subr.mxu1 %v5290_v8 }
 0x192   : > { %4617 = vmatmul.mubr.f32.vlgmr.msra.gmra.mrb[6].mxu1 %v1687_v19 }
 0x193   : > { %4620 = vmatpush3.msra.mxu1 %v1621_v13  ;;  %4621 = vmatprep.mubr.msk.f32.mxu1 %vm5291_vm5, %v5290_v8 }
 0x194   : > { %4624 = vmatprep.subr.mxu1 %v5290_v8 }
 0x19a   : > { %4622 = vmatmul.mubr.f32.vlgmr.msra.gmra.mrb[6].mxu1 %v1688_v21 }
 0x19b   : > { %4625 = vmatpush3.msra.mxu1 %v1699_v20  ;;  %4626 = vmatprep.mubr.msk.f32.mxu1 %vm5291_vm5, %v5290_v8 }
 0x19c   : > { %4629 = vmatprep.subr.mxu1 %v5290_v8 }
 0x1a2   : > { %4627 = vmatmul.mubr.f32.vlgmr.msra.gmra.mrb[6].mxu1 %v1686_v16 }
 0x1a3   : > { %4630 = vmatpush3.msra.mxu1 %v1621_v13  ;;  %4631 = vmatprep.mubr.msk.f32.mxu1 %vm5291_vm5, %v5290_v8  ;;  %v5631_v13 = vand.u32 4294901760, %v2150_v9 }
 0x1a4   : > { %4702 = vmatprep.subr.mxu1 %v5290_v8 }
 0x1aa   : > { %4632 = vmatmul.mubr.f32.vlgmr.msra.gmra.mrb[6].mxu1 %v1686_v16 }
 0x1ab   : > { %4704 = vmatprep.mubr.msk.f32.mxu1 %vm5291_vm5, %v5290_v8 }
 0x231   : > { %v1402_v32 = vpop.f32.mrb[2].mxu1 }
 0x232   : > { %v4565_v34 = vpop.f32.mrb[3].mxu1  ;;  %5004 = vrcp.f32 %v1402_v32  ;;  %v1611_v48 = vmul.f32 %v1402_v32, %v489_v39  ;;  %v1614_v51 = vmul.f32 %v1402_v32, %v490_v46 }
 0x23c   : > { %v5005_v45 = vpop.eup %5004 }
 0x23d   : > { %v2518_v52 = vrot.slane %v5005_v45, 2 }
 0x251   : > { %v1504_v41 = vpop.f32.mrb[4].mxu1 }
 0x252   : > { %v1605_v42 = vsub.f32 %v1504_v41, %v1603_v35  ;;  %v1607_v43 = vrot.slane %v1504_v41, 2  ;;  %v4584_v44 = vpop.f32.mrb[5].mxu1 }
 0x254   : > { %v1609_v49 = vadd.f32 %v1607_v43, %v1598_v26  ;;  %v1610_v50 = vsub.f32 %v487_v40, %v1605_v42 }
 0x256   : > { %v1612_v53 = vadd.f32 %v1611_v48, %v1610_v50  ;;  %v1613_v54 = vsub.f32 %v488_v47, %v1609_v49 }
 0x258   : > { %v1615_v55 = vadd.f32 %v1614_v51, %v1613_v54  ;;  %v2520_v56 = vmul.f32 %v2518_v52, %v1612_v53  ;;  %4102 = vst.msk [vmem:[#allocation3] sm:$0x3] %vm4101_vm10, %v1612_v53 }
 0x25a   : > { %v2521_v57 = vmul.f32 %v2518_v52, %v1615_v55  ;;  %4103 = vst.msk [vmem:[#allocation5] sm:$0x3] %vm4101_vm10, %v1615_v55 }
 0x25c   : > { %v2523_v58 = vrot.slane %v2521_v57, 6 }
 0x25e   : > { %v2525_v59 = vsel %vm955_vm8, %v2520_v56, %v2523_v58 }
 0x27d   : > { %v2062_v60 = vpop.f32.mrb[6].mxu1 }
 0x27e   : > { %5006 = vrcp.f32 %v2062_v60  ;;  %v4633_v61 = vpop.f32.mrb[7].mxu1 }
 0x288   : > { %v5007_v63 = vpop.eup %5006 }
 0x289   : > { %v2068_v0 = vsel %vm495_vm4, %v5007_v63, 0 }
 0x28a   : > { %v2136_v3 = vand.u32 4294901760, %v2068_v0 }
 0x28c   : > { %v2137_v5 = vsub.f32 %v2068_v0, %v2136_v3 }
 0x28e   : > { %v2138_v10 = vand.u32 4294901760, %v2137_v5 }
 0x290   : > { %v2139_v12 = vsub.f32 %v2137_v5, %v2138_v10 }
 0x292   : > { %v2140_v14 = vand.u32 4294901760, %v2139_v12 }
 0x294   : > { %4637 = vmatmul.mubr.f32.vlgmr.msra.gmra.mrb[4].mxu0 %v2140_v14 }
 0x295   : > { %4640 = vmatpush3.msra.mxu0 %v5631_v13  ;;  %4641 = vmatprep.mubr.msk.f32.mxu0 %vm5291_vm5, %v5290_v8 }
 0x296   : > { %4644 = vmatprep.subr.mxu0 %v5290_v8 }
 0x29c   : > { %4642 = vmatmul.mubr.f32.vlgmr.msra.gmra.mrb[4].mxu0 %v2136_v3 }
 0x29d   : > { %4645 = vmatpush3.msra.mxu0 %v5623_v62  ;;  %4646 = vmatprep.mubr.msk.f32.mxu0 %vm5291_vm5, %v5290_v8 }
 0x29e   : > { %4649 = vmatprep.subr.mxu0 %v5290_v8 }
 0x2a4   : > { %4647 = vmatmul.mubr.f32.vlgmr.msra.gmra.mrb[4].mxu0 %v2137_v5 }
 0x2a5   : > { %4650 = vmatpush3.msra.mxu0 %v5610_v31  ;;  %4651 = vmatprep.mubr.msk.f32.mxu0 %vm5291_vm5, %v5290_v8 }
 0x2a6   : > { %4654 = vmatprep.subr.mxu0 %v5290_v8 }
 0x2ac   : > { %4652 = vmatmul.mubr.f32.vlgmr.msra.gmra.mrb[4].mxu0 %v2138_v10 }
 0x2ad   : > { %4655 = vmatpush3.msra.mxu0 %v5627_v2  ;;  %4656 = vmatprep.mubr.msk.f32.mxu0 %vm5291_vm5, %v5290_v8 }
 0x2ae   : > { %4659 = vmatprep.subr.mxu0 %v5290_v8 }
 0x2b4   : > { %4657 = vmatmul.mubr.f32.vlgmr.msra.gmra.mrb[4].mxu0 %v2136_v3 }
 0x2b5   : > { %4660 = vmatpush3.msra.mxu0 %v5610_v31  ;;  %4661 = vmatprep.mubr.msk.f32.mxu0 %vm5291_vm5, %v5290_v8 }
 0x2b6   : > { %4824 = vmatprep.subr.bf16.mxu0 %v5292_v25 }
 0x2bc   : > { %4662 = vmatmul.mubr.f32.vlgmr.msra.gmra.mrb[4].mxu0 %v2136_v3 }
 0x2bd   : > { %4826 = vmatpush3.bf16.msra.mxu0 %v5535_v1  ;;  %4680 = vmatprep.mubr.msk.f32.mxu0 %vm5291_vm5, %v5290_v8 }
 0x2be   : > { %4827 = vmatprep.subr.bf16.mxu0 %v5292_v25 }
 0x2c1   : > { %4829 = vmatpush3.bf16.msra.mxu0 %v5549_v4 }
 0x2c2   : > { %4830 = vmatprep.subr.bf16.mxu0 %v5292_v25 }
 0x2c5   : > { %4832 = vmatpush3.bf16.msra.mxu0 %v5561_v11 }
 0x2c6   : > { %4833 = vmatprep.subr.bf16.mxu0 %v5292_v25 }
 0x2c9   : > { %4835 = vmatpush3.bf16.msra.mxu0 %v5575_v17 }
 0x2ca   : > { %4836 = vmatprep.subr.bf16.mxu0 %v5292_v25 }
 0x2cc   : > { %4681 = vmatmul.mubr.msk.f32.vlgmr.msra.gmra.mrb[6].mxu0 %vm2526_vm11, %v2525_v59 }
 0x2cd   : > { %4838 = vmatpush3.bf16.msra.mxu0 %v5453_v27  ;;  %4699 = vmatprep.mubr.msk.f32.mxu0 %vm5291_vm5, %v5290_v8 }
 0x2ce   : > { %4839 = vmatprep.subr.bf16.mxu0 %v5292_v25 }
 0x2d1   : > { %4841 = vmatpush3.bf16.msra.mxu0 %v5465_v30 }
 0x2d2   : > { %4842 = vmatprep.subr.bf16.mxu0 %v5292_v25 }
 0x2d5   : > { %4844 = vmatpush3.bf16.msra.mxu0 %v5477_v33 }
 0x2d6   : > { %4845 = vmatprep.subr.bf16.mxu0 %v5292_v25 }
 0x2d9   : > { %4847 = vmatpush3.bf16.msra.mxu0 %v5489_v36 }
 0x2da   : > { %4732 = vmatprep.subr.mxu0 %v5290_v8 }
 0x2dc   : > { %4700 = vmatmul.mubr.msk.f32.vlgmr.msra.gmra.mrb[8].mxu0 %vm2526_vm11, %v2525_v59 }
 0x2dd   : > { %4733 = vmatpush3.msra.mxu0 %v5610_v31  ;;  %4734 = vmatprep.mubr.msk.f32.mxu0 %vm5291_vm5, %v5290_v8 }
 0x2de   : > { %4737 = vmatprep.subr.mxu0 %v5290_v8 }
 0x38f   : > { %v2512_v27 = vpop.f32.mrb[4].mxu0 }
 0x390   : > { %v4663_v30 = vpop.f32.mrb[5].mxu0  ;;  %5008 = vrcp.f32 %v2512_v27 }
 0x39a   : > { %v5009_v17 = vpop.eup %5008 }
 0x39b   : > { %v2685_v20 = vmul.f32 2.0, %v5009_v17 }
 0x39f   : > { %v2596_v1 = vpop.f32.mrb[6].mxu0 }
 0x3a0   : > { %v4682_v4 = vpop.f32.mrb[7].mxu0 }
 0x3af   : > { %v2666_v33 = vpop.f32.mrb[8].mxu0 }
 0x3b0   : > { %v2671_v11 = vrot.slane %v2666_v33, 2  ;;  %v2674_v25 = vrot.slane %v2666_v33, 6  ;;  %v4701_v15 = vpop.f32.mrb[9].mxu0 }
 0x3b2   : > { %v2673_v36 = vadd.f32 %v2671_v11, %v2596_v1  ;;  %v2676_v16 = vsub.f32 %v2596_v1, %v2674_v25 }
 0x3b4   : > { %v2677_v18 = vmul.f32 %v2673_v36, %v2512_v27  ;;  %v2680_v19 = vrot.slane %v2676_v16, 2 }
 0x3b6   : > { %v2678_v21 = vadd.f32 %v2677_v18, %v5495_v37  ;;  %v2682_v22 = vmul.f32 %v2680_v19, %v2512_v27 }
 0x3b8   : > { %v2683_v23 = vadd.f32 %v2682_v22, %v5497_v38  ;;  %v2686_v24 = vmul.f32 %v2685_v20, %v2678_v21  ;;  %4109 = vst.msk [vmem:[#allocation13] sm:$0x3] %vm2703_vm12, %v2678_v21  ;;  %v2748_v38 = vsel %vm1410_vm6, %v5607_v29, 0 }
 0x3b9   : > { %v5684_v43 = vand.u32 4294901760, %v2748_v38 }
 0x3ba   : > { %v2687_v6 = vmul.f32 %v2685_v20, %v2683_v23  ;;  %4110 = vst.msk [vmem:[#allocation14] sm:$0x3] %vm2703_vm12, %v2683_v23  ;;  %v2688_v26 = vmul.f32 0.35355338, %v2686_v24  ;;  %v2693_v34 = vmul.f32 -0.35355338, %v2686_v24 }
 0x3bb   : > { %4703 = vmatpush3.xpose.msra.mxu1 %v5684_v43  ;;  %v5689_v10 = vsub.f32 %v2748_v38, %v5684_v43 }
 0x3bc   : > { %v2689_v28 = vmul.f32 0.35355338, %v2687_v6  ;;  %v2691_v32 = vmul.f32 -0.35355338, %v2687_v6  ;;  %4707 = vmatprep.subr.mxu1 %v5290_v8 }
 0x3bd   : > { %v5693_v36 = vand.u32 4294901760, %v5689_v10 }
 0x3be   : > { %v2690_v35 = vadd.f32 %v2689_v28, %v2688_v26  ;;  %v2692_v39 = vadd.f32 %v2691_v32, %v2688_v26  ;;  %v2694_v40 = vadd.f32 %v2693_v34, %v2689_v28  ;;  %v2695_v41 = vadd.f32 %v2693_v34, %v2691_v32 }
 0x3bf   : > { %v2830_v20 = vsub.f32 %v5689_v10, %v5693_v36 }
 0x3c0   : > { %5278 = vmaxabs.init.f32.vacc2 %v2690_v35, %v2692_v39 }
 0x3c1   : > { %v5701_v23 = vand.u32 4294901760, %v2830_v20 }
 0x3c2   : > { %5279 = vmaxabs.f32.vacc2 %v2694_v40, %v2695_v41 }
 0x3c4   : > { %v5280_v37 = vmovacc.low.even.vacc2 }
 0x3c6   : > { %v2704_v42 = vsel %vm2703_vm12, %v5280_v37, -inf }
 0x3c7   : > { %2705 = vmax.xlane.f32.xlu0 %v2704_v42 }
 0x454   : > { %v2706_v44 = vpop.xlane.xlu0 %2705 }
 0x455   : > { %v2707_v45 = vrot.slane %v2706_v44, 4 }
 0x457   : > { %v2708_v46 = vmax.f32 %v2706_v44, %v2707_v45 }
 0x459   : > { %v2709_v47 = vrot.slane %v2708_v46, 2 }
 0x45b   : > { %v2710_v48 = vmax.f32 %v2708_v46, %v2709_v47 }
 0x45d   : > { %v2711_v49 = vrot.slane %v2710_v48, 1 }
 0x45f   : > { %v2712_v50 = vmax.f32 %v2710_v48, %v2711_v49 }
 0x461   : > { %4917 = vpush %v2712_v50  ;;  %v4117_v50 = vand.u32 2147483647, %v5404_v7 }
 0x492   : > { %s4918_s29 = spop %4917 }
 0x493   : > { %v2714_v51 = vstv %s4918_s29 }
 0x494   : > { %v2715_v52 = vsub.f32 %v2690_v35, %v2714_v51  ;;  %v2721_v53 = vsub.f32 %v2692_v39, %v2714_v51  ;;  %v2729_v54 = vsub.f32 %v2694_v40, %v2714_v51  ;;  %v2737_v29 = vsub.f32 %v2695_v41, %v2714_v51 }
 0x495   : > { %v4118_v51 = vmul.f32 1e-05, %v4117_v50 }
 0x496   : > { %v2716_v55 = vmul.f32 1.442695, %v2715_v52  ;;  %v2722_v56 = vmul.f32 1.442695, %v2721_v53  ;;  %v2730_v57 = vmul.f32 1.442695, %v2729_v54 }
 0x497   : > { %v2738_v58 = vmul.f32 1.442695, %v2737_v29 }
 0x498   : > { %5010 = vpow2.f32 %v2716_v55  ;;  %v4119_v55 = vadd.f32 1e-08, %v4118_v51 }
 0x499   : > { %5012 = vpow2.f32 %v2722_v56 }
 0x49a   : > { %5014 = vpow2.f32 %v2730_v57 }
 0x49b   : > { %5016 = vpow2.f32 %v2738_v58 }
 0x4a2   : > { %v5011_v59 = vpop.eup %5010 }
 0x4a3   : > { %v5013_v60 = vpop.eup %5012  ;;  %v2719_v61 = vmul.f32 0.35355338, %v5011_v59 }
 0x4a4   : > { %v5015_v63 = vpop.eup %5014  ;;  %v2724_v0 = vadd.f32 %v5013_v60, %v5011_v59  ;;  %v2725_v3 = vmul.f32 0.35355338, %v5013_v60  ;;  %v2727_v5 = vmul.f32 -0.35355338, %v5013_v60 }
 0x4a5   : > { %v5017_v9 = vpop.eup %5016  ;;  %v2733_v12 = vmul.f32 -0.35355338, %v5015_v63  ;;  %v2735_v1 = vmul.f32 0.35355338, %v5015_v63 }
 0x4a6   : > { %v2732_v14 = vadd.f32 %v5015_v63, %v2724_v0  ;;  %v2726_v27 = vadd.f32 %v2725_v3, %v2719_v61  ;;  %v2728_v30 = vadd.f32 %v2727_v5, %v2719_v61  ;;  %v2741_v25 = vmul.f32 -0.35355338, %v5017_v9 }
 0x4a8   : > { %v2740_v4 = vadd.f32 %v5017_v9, %v2732_v14  ;;  %v2734_v33 = vadd.f32 %v2733_v12, %v2726_v27  ;;  %v2736_v11 = vadd.f32 %v2735_v1, %v2728_v30 }
 0x4aa   : > { %v2745_v15 = vsel %vm1410_vm6, %v2740_v4, 0  ;;  %v5695_v16 = vadd.f32 %v2741_v25, %v2734_v33  ;;  %v5697_v17 = vadd.f32 %v2741_v25, %v2736_v11 }
 0x4ab   : > { %v2816_v18 = vand.u32 4294901760, %v2745_v15 }
 0x4ad   : > { %v2817_v19 = vsub.f32 %v2745_v15, %v2816_v18 }
 0x4af   : > { %v2818_v21 = vand.u32 4294901760, %v2817_v19 }
 0x4b1   : > { %v2819_v22 = vsub.f32 %v2817_v19, %v2818_v21 }
 0x4b3   : > { %v2820_v24 = vand.u32 4294901760, %v2819_v22 }
 0x4b5   : > { %4705 = vmatmul.mubr.f32.vlgmr.msra.gmra.mrb[8].mxu1 %v2820_v24 }
 0x4b6   : > { %4708 = vmatpush3.xpose.msra.mxu1 %v5701_v23  ;;  %4709 = vmatprep.mubr.msk.f32.mxu1 %vm5291_vm5, %v5290_v8 }
 0x4b7   : > { %4712 = vmatprep.subr.mxu1 %v5290_v8 }
 0x4bd   : > { %4710 = vmatmul.mubr.f32.vlgmr.msra.gmra.mrb[8].mxu1 %v2816_v18 }
 0x4be   : > { %4713 = vmatpush3.xpose.msra.mxu1 %v5689_v10  ;;  %4714 = vmatprep.mubr.msk.f32.mxu1 %vm5291_vm5, %v5290_v8 }
 0x4bf   : > { %4717 = vmatprep.subr.mxu1 %v5290_v8 }
 0x4c5   : > { %4715 = vmatmul.mubr.f32.vlgmr.msra.gmra.mrb[8].mxu1 %v2817_v19 }
 0x4c6   : > { %4718 = vmatpush3.xpose.msra.mxu1 %v5684_v43  ;;  %4719 = vmatprep.mubr.msk.f32.mxu1 %vm5291_vm5, %v5290_v8 }
 0x4c7   : > { %4722 = vmatprep.subr.mxu1 %v5290_v8 }
 0x4cd   : > { %4720 = vmatmul.mubr.f32.vlgmr.msra.gmra.mrb[8].mxu1 %v2818_v21 }
 0x4ce   : > { %4723 = vmatpush3.xpose.msra.mxu1 %v5693_v36  ;;  %4724 = vmatprep.mubr.msk.f32.mxu1 %vm5291_vm5, %v5290_v8 }
 0x4cf   : > { %4727 = vmatprep.subr.mxu1 %v5290_v8 }
 0x4d5   : > { %4725 = vmatmul.mubr.f32.vlgmr.msra.gmra.mrb[8].mxu1 %v2816_v18 }
 0x4d6   : > { %4728 = vmatpush3.xpose.msra.mxu1 %v5684_v43  ;;  %4729 = vmatprep.mubr.msk.f32.mxu1 %vm5291_vm5, %v5290_v8 }
 0x4d7   : > { %4762 = vmatprep.subr.mxu1 %v5290_v8 }
 0x4dd   : > { %4730 = vmatmul.mubr.f32.vlgmr.msra.gmra.mrb[8].mxu1 %v2816_v18 }
 0x4de   : > { %4763 = vmatpush3.xpose.msra.mxu1 %v5684_v43  ;;  %4764 = vmatprep.mubr.msk.f32.mxu1 %vm5291_vm5, %v5290_v8 }
 0x4df   : > { %4767 = vmatprep.subr.mxu1 %v5290_v8 }
 0x5b0   : > { %v3192_v6 = vpop.f32.mrb[8].mxu1 }
 0x5b1   : > { %5018 = vrcp.f32 %v3192_v6  ;;  %v4731_v26 = vpop.f32.mrb[9].mxu1 }
 0x5bb   : > { %v5019_v28 = vpop.eup %5018 }
 0x5bc   : > { %v3198_v32 = vsel %vm495_vm4, %v5019_v28, 0 }
 0x5bd   : > { %v3266_v34 = vand.u32 4294901760, %v3198_v32 }
 0x5bf   : > { %v3267_v35 = vsub.f32 %v3198_v32, %v3266_v34 }
 0x5c1   : > { %v3268_v39 = vand.u32 4294901760, %v3267_v35 }
 0x5c3   : > { %v3269_v40 = vsub.f32 %v3267_v35, %v3268_v39 }
 0x5c5   : > { %v3270_v41 = vand.u32 4294901760, %v3269_v40 }
 0x5c7   : > { %4735 = vmatmul.mubr.f32.vlgmr.msra.gmra.mrb[10].mxu0 %v3270_v41 }
 0x5c8   : > { %4738 = vmatpush3.msra.mxu0 %v5631_v13  ;;  %4739 = vmatprep.mubr.msk.f32.mxu0 %vm5291_vm5, %v5290_v8 }
 0x5c9   : > { %4742 = vmatprep.subr.mxu0 %v5290_v8 }
 0x5cf   : > { %4740 = vmatmul.mubr.f32.vlgmr.msra.gmra.mrb[10].mxu0 %v3266_v34 }
 0x5d0   : > { %4743 = vmatpush3.msra.mxu0 %v5623_v62  ;;  %4744 = vmatprep.mubr.msk.f32.mxu0 %vm5291_vm5, %v5290_v8 }
 0x5d1   : > { %4747 = vmatprep.subr.mxu0 %v5290_v8 }
 0x5d7   : > { %4745 = vmatmul.mubr.f32.vlgmr.msra.gmra.mrb[10].mxu0 %v3267_v35 }
 0x5d8   : > { %4748 = vmatpush3.msra.mxu0 %v5610_v31  ;;  %4749 = vmatprep.mubr.msk.f32.mxu0 %vm5291_vm5, %v5290_v8 }
 0x5d9   : > { %4752 = vmatprep.subr.mxu0 %v5290_v8 }
 0x5df   : > { %4750 = vmatmul.mubr.f32.vlgmr.msra.gmra.mrb[10].mxu0 %v3268_v39 }
 0x5e0   : > { %4753 = vmatpush3.msra.mxu0 %v5627_v2  ;;  %4754 = vmatprep.mubr.msk.f32.mxu0 %vm5291_vm5, %v5290_v8 }
 0x5e1   : > { %4757 = vmatprep.subr.mxu0 %v5290_v8 }
 0x5e7   : > { %4755 = vmatmul.mubr.f32.vlgmr.msra.gmra.mrb[10].mxu0 %v3266_v34 }
 0x5e8   : > { %4758 = vmatpush3.msra.mxu0 %v5610_v31  ;;  %4759 = vmatprep.mubr.msk.f32.mxu0 %vm5291_vm5, %v5290_v8 }
 0x5ef   : > { %4760 = vmatmul.mubr.f32.vlgmr.msra.gmra.mrb[10].mxu0 %v3266_v34 }
 0x6c2   : > { %v3642_v62 = vpop.f32.mrb[10].mxu0 }
 0x6c3   : > { %v3646_v13 = vmul.f32 %v3642_v62, %v5695_v16  ;;  %v3647_v37 = vmul.f32 %v3642_v62, %v5697_v17  ;;  %v4761_v42 = vpop.f32.mrb[11].mxu0 }
 0x6c5   : > { %v3648_v38 = vmul.f32 %v3646_v13, %v3646_v13  ;;  %v3649_v2 = vmul.f32 %v3647_v37, %v3647_v37  ;;  %4107 = vst.msk [vmem:[#allocation10] sm:$0x3] %vm2703_vm12, %v3646_v13  ;;  %4108 = vst.msk [vmem:[#allocation11] sm:$0x3] %vm2703_vm12, %v3647_v37 }
 0x6c7   : > { %v3650_v44 = vadd.f32 %v3649_v2, %v3648_v38 }
 0x6c9   : > { %v3652_v45 = vsel %vm1410_vm6, %v3650_v44, 0 }
 0x6ca   : > { %v3720_v31 = vand.u32 4294901760, %v3652_v45 }
 0x6cc   : > { %v3721_v46 = vsub.f32 %v3652_v45, %v3720_v31 }
 0x6ce   : > { %v3722_v47 = vand.u32 4294901760, %v3721_v46 }
 0x6d0   : > { %v3723_v48 = vsub.f32 %v3721_v46, %v3722_v47 }
 0x6d2   : > { %v3724_v49 = vand.u32 4294901760, %v3723_v48 }
 0x6d4   : > { %4765 = vmatmul.mubr.f32.vlgmr.msra.gmra.mrb[10].mxu1 %v3724_v49 }
 0x6d5   : > { %4768 = vmatpush3.xpose.msra.mxu1 %v5701_v23  ;;  %4769 = vmatprep.mubr.msk.f32.mxu1 %vm5291_vm5, %v5290_v8 }
 0x6d6   : > { %4772 = vmatprep.subr.mxu1 %v5290_v8 }
 0x6dc   : > { %4770 = vmatmul.mubr.f32.vlgmr.msra.gmra.mrb[10].mxu1 %v3720_v31 }
 0x6dd   : > { %4773 = vmatpush3.xpose.msra.mxu1 %v5689_v10  ;;  %4774 = vmatprep.mubr.msk.f32.mxu1 %vm5291_vm5, %v5290_v8 }
 0x6de   : > { %4777 = vmatprep.subr.mxu1 %v5290_v8 }
 0x6e4   : > { %4775 = vmatmul.mubr.f32.vlgmr.msra.gmra.mrb[10].mxu1 %v3721_v46 }
 0x6e5   : > { %4778 = vmatpush3.xpose.msra.mxu1 %v5684_v43  ;;  %4779 = vmatprep.mubr.msk.f32.mxu1 %vm5291_vm5, %v5290_v8 }
 0x6e6   : > { %4782 = vmatprep.subr.mxu1 %v5290_v8 }
 0x6ec   : > { %4780 = vmatmul.mubr.f32.vlgmr.msra.gmra.mrb[10].mxu1 %v3722_v47 }
 0x6ed   : > { %4783 = vmatpush3.xpose.msra.mxu1 %v5693_v36  ;;  %4784 = vmatprep.mubr.msk.f32.mxu1 %vm5291_vm5, %v5290_v8 }
 0x6ee   : > { %4787 = vmatprep.subr.mxu1 %v5290_v8 }
 0x6f4   : > { %4785 = vmatmul.mubr.f32.vlgmr.msra.gmra.mrb[10].mxu1 %v3720_v31 }
 0x6f5   : > { %4788 = vmatpush3.xpose.msra.mxu1 %v5684_v43  ;;  %4789 = vmatprep.mubr.msk.f32.mxu1 %vm5291_vm5, %v5290_v8  ;;  %v4112_v8 = vstv %s4111_s30 }
 0x6f6   : > { %4114 = vst.msk [vmem:[#allocation16] sm:$0x1] %vm4113_vm13, %v4112_v8 }
 0x6fc   : > { %4790 = vmatmul.mubr.f32.vlgmr.msra.gmra.mrb[10].mxu1 %v3720_v31 }
 0x7cf   : > { %v4096_v52 = vpop.f32.mrb[10].mxu1 }
 0x7d0   : > { %v4100_v53 = vsub.f32 1.0, %v4096_v52  ;;  %v4791_v54 = vpop.f32.mrb[11].mxu1 }
 0x7d2   : > { %v4115_v29 = vsub.f32 %v4100_v53, %v5404_v7  ;;  %4106 = vst.msk [vmem:[#allocation8] sm:$0x3] %vm4104_vm9, %v4100_v53 }
 0x7d4   : > { %v4116_v56 = vand.u32 2147483647, %v4115_v29 }
 0x7d6   : > { %v4120_v57 = vsub.f32 %v4116_v56, %v4119_v55 }
 0x7d8   : > { %v4121_v58 = vsel %vm4104_vm9, %v4120_v57, -inf }
 0x7d9   : > { %4122 = vmax.xlane.f32.xlu0 %v4121_v58 }
 0x866   : > { %v4123_v43 = vpop.xlane.xlu0 %4122 }
 0x867   : > { %v4124_v59 = vrot.slane %v4123_v43, 4 }
 0x869   : > { %v4125_v60 = vmax.f32 %v4123_v43, %v4124_v59 }
 0x86b   : > { %v4126_v61 = vrot.slane %v4125_v60, 2 }
 0x86d   : > { %v4127_v63 = vmax.f32 %v4125_v60, %v4126_v61 }
 0x86f   : > { %v4128_v0 = vrot.slane %v4127_v63, 1 }
 0x871   : > { %v4129_v3 = vmax.f32 %v4127_v63, %v4128_v0 }
 0x873   : > { %4919 = vpush %v4129_v3 }
 0x8a4   : > { %s4920_s16 = spop %4919 }
 0x8a5   : > { %p4131_p5 = scmp.le.f32.partialorder %s4920_s16, 0.0 }
 0x8a7   : > { %s4132_s17 = scalar_select %p4131_p5, 1, 0 }
 0x8a9   : > { %4134 = sst [smem:[#allocation2]] %s4132_s17 }
 0x8aa PF: > { %p4957_p6 = scmp.eq.s32.totalorder %s5388_s19, 3  ;;  %s5293_s20 = smov [#allocation5]  }
 0x8ab   : > { %s4153_s21 = sshll.u32 %s5293_s20, 4  ;;  %s5294_s22 = smov [#allocation8]   ;;  %s4154_s21 = int_to_ptr.vmem [resolvable:$true] %s4153_s21 }
 0x8ac   : > { %s4175_s23 = sshll.u32 %s5294_s22, 4  ;;  %s5020_s24 = scalar_lea.vmem %s4154_s21, 32  ;;  %s4176_s23 = int_to_ptr.vmem [resolvable:$true] %s4175_s23 }
 0x8ad   : > { %p5021_p7 = scmp.ne.s32.totalorder %s4154_s21, %s5020_s24  ;;  %p5027_p10 = scmp.lt.s32.totalorder %s4154_s21, %s4154_s21 }
 0x8ae   : > { %p5028_p11 = scmp.lt.s32.totalorder %s5020_s24, %s5020_s24 }
 0x8af   : > { %p5022_p8 = pnand %p5021_p7, %p4957_p6 }
 0x8b0   : > { %p5029_p12 = por %p5028_p11, %p5027_p10 }
 0x8b1   : > { %p5023_p9 = pneg %p5022_p8 }
 0x8b3   : > { %p5030_p13 = pnand %p5029_p12, %p5023_p9 }
 0x8b5   : > { %5033 = shalt.err (!%p5030_p13)
}
 0x8b6   : > { %s5034_s27 = scalar_lea.hbm %s5984_s8, 32 }
 0x8b7   : > { %p5035_p0 = scmp.ne.s32.totalorder %s5984_s8, %s5034_s27  ;;  %p5040_p3 = scmp.lt.u32.totalorder %s5034_s27, %s5984_s8 }
 0x8b9   : > { %p5036_p1 = pnand %p5035_p0, %p4957_p6 }
 0x8bb   : > { %p5037_p2 = pneg %p5036_p1 }
 0x8bd   : > { %p5042_p4 = pnand %p5040_p3, %p5037_p2 }
 0x8bf   : > { %5045 = shalt.err (!%p5042_p4)
}
 0x8c0   : > { %4924 = dma.vmem_to_hbm [thread:$0]  (%p4957_p6), %s4154_s21, 32, %s5984_s8, [#allocation6]  }
 0x8c1   : > { %s5046_s22 = scalar_lea.vmem %s4176_s23, 32  ;;  %p5053_p9 = scmp.lt.s32.totalorder %s4176_s23, %s4176_s23 }
 0x8c2   : > { %p5047_p5 = scmp.ne.s32.totalorder %s4176_s23, %s5046_s22  ;;  %p5054_p10 = scmp.lt.s32.totalorder %s5046_s22, %s5046_s22 }
 0x8c4   : > { %p5048_p7 = pnand %p5047_p5, %p4957_p6  ;;  %p5055_p11 = por %p5054_p10, %p5053_p9 }
 0x8c6   : > { %p5049_p8 = pneg %p5048_p7 }
 0x8c8   : > { %p5056_p12 = pnand %p5055_p11, %p5049_p8 }
 0x8ca   : > { %5059 = shalt.err (!%p5056_p12)
}
 0x8cb   : > { %s5060_s26 = scalar_lea.hbm %s5986_s10, 32 }
 0x8cc   : > { %p5061_p13 = scmp.ne.s32.totalorder %s5986_s10, %s5060_s26  ;;  %p5066_p2 = scmp.lt.u32.totalorder %s5060_s26, %s5986_s10 }
 0x8ce   : > { %p5062_p0 = pnand %p5061_p13, %p4957_p6 }
 0x8d0   : > { %p5063_p1 = pneg %p5062_p0 }
 0x8d2   : > { %p5068_p3 = pnand %p5066_p2, %p5063_p1 }
 0x8d4   : > { %5071 = shalt.err (!%p5068_p3)
}
 0x8d5   : > { %4928 = dma.vmem_to_hbm [thread:$0]  (%p4957_p6), %s4176_s23, 32, %s5986_s10, [#allocation9]  }
 0x8d6   : > { %s5295_s17 = smov [#allocation11]   ;;  %s5296_s22 = smov [#allocation14]  }
 0x8d7   : > { %s4197_s20 = sshll.u32 %s5295_s17, 4  ;;  %s4219_s24 = sshll.u32 %s5296_s22, 4  ;;  %s4198_s20 = int_to_ptr.vmem [resolvable:$true] %s4197_s20  ;;  %s4220_s24 = int_to_ptr.vmem [resolvable:$true] %s4219_s24 }
 0x8d8   : > { %s5072_s25 = scalar_lea.vmem %s4198_s20, 32  ;;  %p5079_p8 = scmp.lt.s32.totalorder %s4198_s20, %s4198_s20 }
 0x8d9   : > { %p5073_p4 = scmp.ne.s32.totalorder %s4198_s20, %s5072_s25  ;;  %p5080_p9 = scmp.lt.s32.totalorder %s5072_s25, %s5072_s25 }
 0x8db   : > { %p5074_p5 = pnand %p5073_p4, %p4957_p6  ;;  %p5081_p10 = por %p5080_p9, %p5079_p8 }
 0x8dd   : > { %p5075_p7 = pneg %p5074_p5 }
 0x8df   : > { %p5082_p11 = pnand %p5081_p10, %p5075_p7 }
 0x8e1   : > { %5085 = shalt.err (!%p5082_p11)
}
 0x8e2   : > { %s5086_s23 = scalar_lea.hbm %s5988_s12, 32 }
 0x8e3   : > { %p5087_p12 = scmp.ne.s32.totalorder %s5988_s12, %s5086_s23  ;;  %p5092_p1 = scmp.lt.u32.totalorder %s5086_s23, %s5988_s12 }
 0x8e5   : > { %p5088_p13 = pnand %p5087_p12, %p4957_p6 }
 0x8e7   : > { %p5089_p0 = pneg %p5088_p13 }
 0x8e9   : > { %p5094_p2 = pnand %p5092_p1, %p5089_p0 }
 0x8eb   : > { %5097 = shalt.err (!%p5094_p2)
}
 0x8ec   : > { %4932 = dma.vmem_to_hbm [thread:$0]  (%p4957_p6), %s4198_s20, 32, %s5988_s12, [#allocation12]  }
 0x8ed   : > { %s5098_s22 = scalar_lea.vmem %s4220_s24, 32  ;;  %p5105_p7 = scmp.lt.s32.totalorder %s4220_s24, %s4220_s24 }
 0x8ee   : > { %p5099_p3 = scmp.ne.s32.totalorder %s4220_s24, %s5098_s22  ;;  %p5106_p8 = scmp.lt.s32.totalorder %s5098_s22, %s5098_s22 }
 0x8f0   : > { %p5100_p4 = pnand %p5099_p3, %p4957_p6  ;;  %p5107_p9 = por %p5106_p8, %p5105_p7 }
 0x8f2   : > { %p5101_p5 = pneg %p5100_p4 }
 0x8f4   : > { %p5108_p10 = pnand %p5107_p9, %p5101_p5 }
 0x8f6   : > { %5111 = shalt.err (!%p5108_p10)
}
 0x8f7   : > { %s5112_s27 = scalar_lea.hbm %s5990_s14, 32 }
 0x8f8   : > { %p5113_p11 = scmp.ne.s32.totalorder %s5990_s14, %s5112_s27  ;;  %p5118_p0 = scmp.lt.u32.totalorder %s5112_s27, %s5990_s14 }
 0x8fa   : > { %p5114_p12 = pnand %p5113_p11, %p4957_p6 }
 0x8fc   : > { %p5115_p13 = pneg %p5114_p12 }
 0x8fe   : > { %p5120_p1 = pnand %p5118_p0, %p5115_p13 }
 0x900   : > { %5123 = shalt.err (!%p5120_p1)
}
 0x901   : > { %4936 = dma.vmem_to_hbm [thread:$0]  (%p4957_p6), %s4220_s24, 32, %s5990_s14, [#allocation15]  }
 0x902   : > { %s5297_s16 = smov [#allocation3]   ;;  %s5298_s22 = smov [#allocation7]  }
 0x903   : > { %s4142_s17 = sshll.u32 %s5297_s16, 4  ;;  %s4164_s25 = sshll.u32 %s5298_s22, 4  ;;  %s4143_s17 = int_to_ptr.vmem [resolvable:$true] %s4142_s17  ;;  %s5849_s25 = int_to_ptr.vmem [resolvable:$true] %s4164_s25 }
 0x904   : > { %s5124_s26 = scalar_lea.vmem %s4143_s17, 32  ;;  %p5131_p5 = scmp.lt.s32.totalorder %s4143_s17, %s4143_s17 }
 0x905   : > { %p5125_p2 = scmp.ne.s32.totalorder %s4143_s17, %s5124_s26  ;;  %p5132_p7 = scmp.lt.s32.totalorder %s5124_s26, %s5124_s26 }
 0x907   : > { %p5126_p3 = pnand %p5125_p2, %p4957_p6  ;;  %p5133_p8 = por %p5132_p7, %p5131_p5 }
 0x909   : > { %p5127_p4 = pneg %p5126_p3 }
 0x90b   : > { %p5134_p9 = pnand %p5133_p8, %p5127_p4 }
 0x90d   : > { %5137 = shalt.err (!%p5134_p9)
}
 0x90e   : > { %s5138_s24 = scalar_lea.hbm %s5983_s7, 32 }
 0x90f   : > { %p5139_p10 = scmp.ne.s32.totalorder %s5983_s7, %s5138_s24  ;;  %p5144_p13 = scmp.lt.u32.totalorder %s5138_s24, %s5983_s7 }
 0x911   : > { %p5140_p11 = pnand %p5139_p10, %p4957_p6 }
 0x913   : > { %p5141_p12 = pneg %p5140_p11 }
 0x915   : > { %p5146_p0 = pnand %p5144_p13, %p5141_p12 }
 0x917   : > { %5149 = shalt.err (!%p5146_p0)
}
 0x918   : > { %4922 = dma.vmem_to_hbm [thread:$0]  (%p4957_p6), %s4143_s17, 32, %s5983_s7, [#allocation4]  }
 0x919   : > { %s5150_s22 = scalar_lea.vmem %s5849_s25, 32  ;;  %p5157_p4 = scmp.lt.s32.totalorder %s5849_s25, %s5849_s25 }
 0x91a   : > { %p5151_p1 = scmp.ne.s32.totalorder %s5849_s25, %s5150_s22  ;;  %p5158_p5 = scmp.lt.s32.totalorder %s5150_s22, %s5150_s22 }
 0x91c   : > { %p5152_p2 = pnand %p5151_p1, %p4957_p6  ;;  %p5159_p7 = por %p5158_p5, %p5157_p4 }
 0x91e   : > { %p5153_p3 = pneg %p5152_p2 }
 0x920   : > { %p5160_p8 = pnand %p5159_p7, %p5153_p3 }
 0x922   : > { %5163 = shalt.err (!%p5160_p8)
}
 0x923   : > { %s5164_s23 = scalar_lea.hbm %s5985_s9, 32 }
 0x924   : > { %p5165_p9 = scmp.ne.s32.totalorder %s5985_s9, %s5164_s23  ;;  %p5170_p12 = scmp.lt.u32.totalorder %s5164_s23, %s5985_s9 }
 0x926   : > { %p5166_p10 = pnand %p5165_p9, %p4957_p6 }
 0x928   : > { %p5167_p11 = pneg %p5166_p10 }
 0x92a   : > { %p5172_p13 = pnand %p5170_p12, %p5167_p11 }
 0x92c   : > { %5175 = shalt.err (!%p5172_p13)
}
 0x92d   : > { %4926 = dma.vmem_to_hbm [thread:$0]  (%p4957_p6), %s5849_s25, 32, %s5985_s9, [#allocation6]  }
 0x92e   : > { %s5299_s30 = smov [#allocation10]   ;;  %s5300_s22 = smov [#allocation13]  }
 0x92f   : > { %s4186_s16 = sshll.u32 %s5299_s30, 4  ;;  %s4208_s26 = sshll.u32 %s5300_s22, 4  ;;  %s4187_s16 = int_to_ptr.vmem [resolvable:$true] %s4186_s16  ;;  %s5892_s26 = int_to_ptr.vmem [resolvable:$true] %s4208_s26 }
 0x930   : > { %s5176_s27 = scalar_lea.vmem %s4187_s16, 32  ;;  %p5183_p3 = scmp.lt.s32.totalorder %s4187_s16, %s4187_s16 }
 0x931   : > { %p5177_p0 = scmp.ne.s32.totalorder %s4187_s16, %s5176_s27  ;;  %p5184_p4 = scmp.lt.s32.totalorder %s5176_s27, %s5176_s27 }
 0x933   : > { %p5178_p1 = pnand %p5177_p0, %p4957_p6  ;;  %p5185_p5 = por %p5184_p4, %p5183_p3 }
 0x935   : > { %p5179_p2 = pneg %p5178_p1 }
 0x937   : > { %p5186_p7 = pnand %p5185_p5, %p5179_p2 }
 0x939   : > { %5189 = shalt.err (!%p5186_p7)
}
 0x93a   : > { %s5190_s25 = scalar_lea.hbm %s5987_s11, 32 }
 0x93b   : > { %p5191_p8 = scmp.ne.s32.totalorder %s5987_s11, %s5190_s25  ;;  %p5196_p11 = scmp.lt.u32.totalorder %s5190_s25, %s5987_s11 }
 0x93d   : > { %p5192_p9 = pnand %p5191_p8, %p4957_p6 }
 0x93f   : > { %p5193_p10 = pneg %p5192_p9 }
 0x941   : > { %p5198_p12 = pnand %p5196_p11, %p5193_p10 }
 0x943   : > { %5201 = shalt.err (!%p5198_p12)
}
 0x944   : > { %4930 = dma.vmem_to_hbm [thread:$0]  (%p4957_p6), %s4187_s16, 32, %s5987_s11, [#allocation9]  }
 0x945   : > { %s5202_s22 = scalar_lea.vmem %s5892_s26, 32  ;;  %p5209_p2 = scmp.lt.s32.totalorder %s5892_s26, %s5892_s26 }
 0x946   : > { %p5203_p13 = scmp.ne.s32.totalorder %s5892_s26, %s5202_s22  ;;  %p5210_p3 = scmp.lt.s32.totalorder %s5202_s22, %s5202_s22 }
 0x948   : > { %p5204_p0 = pnand %p5203_p13, %p4957_p6  ;;  %p5211_p4 = por %p5210_p3, %p5209_p2 }
 0x94a   : > { %p5205_p1 = pneg %p5204_p0 }
 0x94c   : > { %p5212_p5 = pnand %p5211_p4, %p5205_p1 }
 0x94e   : > { %5215 = shalt.err (!%p5212_p5)
}
 0x94f   : > { %s5216_s24 = scalar_lea.hbm %s5989_s13, 32 }
 0x950   : > { %p5217_p7 = scmp.ne.s32.totalorder %s5989_s13, %s5216_s24  ;;  %p5222_p10 = scmp.lt.u32.totalorder %s5216_s24, %s5989_s13 }
 0x952   : > { %p5218_p8 = pnand %p5217_p7, %p4957_p6 }
 0x954   : > { %p5219_p9 = pneg %p5218_p8 }
 0x956   : > { %p5224_p11 = pnand %p5222_p10, %p5219_p9 }
 0x958   : > { %5227 = shalt.err (!%p5224_p11)
}
 0x959   : > { %4934 = dma.vmem_to_hbm [thread:$0]  (%p4957_p6), %s5892_s26, 32, %s5989_s13, [#allocation12]  }
 0x95a   : > { %s5301_s29 = smov [#allocation16]  }
 0x95b   : > { %s4230_s30 = sshll.u32 %s5301_s29, 4  ;;  %s4231_s30 = int_to_ptr.vmem [resolvable:$true] %s4230_s30 }
 0x95c   : > { %s5228_s22 = scalar_lea.vmem %s4231_s30, 16  ;;  %s5234_s27 = scalar_lea.vmem %s4231_s30, 32 }
 0x95d   : > { %p5229_p12 = scmp.ne.s32.totalorder %s4231_s30, %s5228_s22  ;;  %p5235_p1 = scmp.lt.s32.totalorder %s4231_s30, %s4231_s30 }
 0x95e   : > { %p5236_p2 = scmp.lt.s32.totalorder %s5234_s27, %s5228_s22 }
 0x95f   : > { %p5230_p13 = pnand %p5229_p12, %p4957_p6 }
 0x960   : > { %p5237_p3 = por %p5236_p2, %p5235_p1 }
 0x961   : > { %p5231_p0 = pneg %p5230_p13 }
 0x963   : > { %p5238_p4 = pnand %p5237_p3, %p5231_p0 }
 0x965   : > { %5241 = shalt.err (!%p5238_p4)
}
 0x966   : > { %s5242_s25 = scalar_lea.hbm %s5991_s15, 16 }
 0x967   : > { %p5243_p5 = scmp.ne.s32.totalorder %s5991_s15, %s5242_s25  ;;  %p5248_p9 = scmp.lt.u32.totalorder %s5242_s25, %s5991_s15 }
 0x969   : > { %p5244_p7 = pnand %p5243_p5, %p4957_p6 }
 0x96b   : > { %p5245_p8 = pneg %p5244_p7 }
 0x96d   : > { %p5250_p10 = pnand %p5248_p9, %p5245_p8 }
 0x96f   : > { %5253 = shalt.err (!%p5250_p10)
}
 0x970   : > { %4938 = dma.vmem_to_hbm [thread:$0]  (%p4957_p6), %s4231_s30, 16, %s5991_s15, [#allocation15]  }
 0x971   : > { %5259 = dma.done.wait (%p4957_p6), [#allocation4], 32  }
 0x972   : > { %5261 = vsyncadd (%p4957_p6), [#allocation4], 4294967264 }
 0x973   : > { %5263 = dma.done.wait (%p4957_p6), [#allocation6], 64  }
 0x974   : > { %5265 = vsyncadd (%p4957_p6), [#allocation6], 4294967232 }
 0x975   : > { %5267 = dma.done.wait (%p4957_p6), [#allocation9], 64  }
 0x976   : > { %5269 = vsyncadd (%p4957_p6), [#allocation9], 4294967232 }
 0x977   : > { %5271 = dma.done.wait (%p4957_p6), [#allocation12], 64  }
 0x978   : > { %5273 = vsyncadd (%p4957_p6), [#allocation12], 4294967232 }
 0x979   : > { %5275 = dma.done.wait (%p4957_p6), [#allocation15], 48  }
 0x97a   : > { %5277 = vsyncadd (%p4957_p6), [#allocation15], 4294967248 }
 0x97b PF: > { %s31_s18 = sadd.s32 1, %s5283_s18  }
 0x97c   : > { %p28_p11 = scmp.ge.s32.totalorder %s31_s18, 6  }
 0x97e   :  { %30 = sbr.rel (!%p28_p11) target bundleno = 5 (0x5), region = 146 }
 0x985   :  { %4275 = vsyncpa [#allocation4], 1 }
 0x986   :  { %4277 = vsyncpa [#allocation4 + $0x1], 1 }
 0x987   :  { %4278 = vsyncpa [#allocation6], 1 }
 0x988   :  { %4279 = vsyncpa [#allocation9], 1 }
 0x989   :  { %4280 = vsyncpa [#allocation12], 1 }
 0x98a   :  { %4281 = vsyncpa [#allocation15], 1 }

</bundles_post_ra>
